<compile_context>
chip_gen: v5e
topology: v5e:2x2
jax: 0.10.0
libtpu: 0.0.40
codegen_flags: <defaults>
</compile_context>

<pallas_src>
import jax
import jax.numpy as jnp
import numpy as np
from jax import lax
from jax.experimental import pallas as pl
from jax.experimental.pallas import tpu as pltpu

# ------------------------- problem sizes -------------------------
B, CIN, H, W = 2, 4, 16, 16
HW = H * W                           # 256 (power of two)
BHW = B * HW                         # 512 -> lane-dense working dimension
EXPAND = 6
CMID = CIN * EXPAND                  # 24
K = 3                                # depthwise kernel size
SE_RATIO = 0.25
CSQ = max(1, int(CIN * SE_RATIO))    # 1
COUT = 4                             # == CIN -> id_skip residual active
BN_EPS = 1e-3

# Packed parameter matrix columns (shape (CMID, NPCOL)).
C_DW0 = 0                 # cols 0..8: depthwise 3x3 taps (bn1 scale folded)
C_BN1B = 9                # depthwise-BN bias
C_BSE = 10                # SE expand bias
C_BN2B = 11               # project-BN bias (first COUT rows valid)
C_BSR = 12                # SE reduce bias (first CSQ rows valid)
C_WSR = 13                # SE reduce weight column (CSQ == 1)
C_WSE = 14                # SE expand weight column (CSQ == 1)
NPCOL = 16


# ------------------------- Pallas kernel -------------------------
def mbconv_kernel(xa_ref, w_exp_ref, w_proj_ref, p_ref, out_ref):
    xa = xa_ref[...]                  # (CIN+1, BHW): input + constant-1 row
    P = p_ref[...]                    # (CMID, NPCOL) packed small params

    # --- expand 1x1 conv on the MXU (BN0 scale AND bias folded) + swish ----
    h = jnp.dot(w_exp_ref[...], xa,
                preferred_element_type=jnp.float32)            # (CMID, BHW)
    h = h * jax.nn.sigmoid(h)

    # --- depthwise 3x3, stride 1, TF-SAME: 8 lane rolls (XLU) + edge masks,
    #     accumulator initialised with the centre tap + BN1 bias -------------
    lane = lax.broadcasted_iota(jnp.int32, (1, BHW), 1)
    pos = lane & (HW - 1)             # intra-image spatial index (HW = 2^n)
    wmod = pos & (W - 1)              # column index (W = 2^n)
    row_ok = [pos >= W, None, pos < (H - 1) * W]               # dh = 0, 1, 2
    col_ok = [wmod >= 1, None, wmod <= W - 2]                  # dw = 0, 1, 2
    acc = h * P[:, C_DW0 + 4:C_DW0 + 5] + P[:, C_BN1B:C_BN1B + 1]
    for dh in range(K):
        for dw in range(K):
            if dh == 1 and dw == 1:
                continue              # centre tap already in acc
            t = dh * K + dw
            off = (dh - 1) * W + (dw - 1)
            tap = pltpu.roll(h, shift=(-off) % BHW, axis=1)
            mh, mw = row_ok[dh], col_ok[dw]
            cond = mh if mw is None else (mw if mh is None else (mh & mw))
            tap = jnp.where(cond, tap, 0.0)
            acc = acc + tap * P[:, C_DW0 + t:C_DW0 + t + 1]
    h = acc * jax.nn.sigmoid(acc)     # (CMID, BHW)

    # --- squeeze & excite (CSQ == 1): per-image lane-sum pool + tiny dots ---
    sums = [jnp.sum(h[:, b * HW:(b + 1) * HW], axis=1, keepdims=True)
            for b in range(B)]
    pooled = jnp.concatenate(sums, axis=1) * (1.0 / HW)         # (CMID, B)
    sq = (jnp.sum(pooled * P[:, C_WSR:C_WSR + 1], axis=0, keepdims=True)
          + P[0:1, C_BSR:C_BSR + 1])                            # (1, B)
    sq = sq * jax.nn.sigmoid(sq)
    ex = sq * P[:, C_WSE:C_WSE + 1] + P[:, C_BSE:C_BSE + 1]     # (CMID, B)
    gate = jax.nn.sigmoid(ex)
    gate_full = gate[:, 0:1]
    for b in range(1, B):
        gate_full = jnp.where(lane >= b * HW, gate[:, b:b + 1], gate_full)
    h = h * gate_full

    # --- project 1x1 conv (MXU, BN2 scale folded) + bias + id_skip residual -
    y = jnp.dot(w_proj_ref[...], h,
                preferred_element_type=jnp.float32)             # (COUT, BHW)
    y = y + P[0:COUT, C_BN2B:C_BN2B + 1] + xa[0:CIN, :]
    # pack images into sublanes -> (B*COUT, HW) = (8, 256) full-vreg store,
    # pure reshape back to NCHW in the wrapper.
    out_ref[...] = jnp.concatenate(
        [y[:, b * HW:(b + 1) * HW] for b in range(B)], axis=0
    ).astype(out_ref.dtype)


# ------------------------- wrapper -------------------------
def mbconv_forward(x_nchw, kp):
    # NCHW -> (CIN, B*HW): tiny XLA transpose outside the kernel, plus a
    # constant-1 row so the expand matmul folds the BN0 bias.
    x = jnp.transpose(x_nchw.reshape(B, CIN, HW), (1, 0, 2)).reshape(CIN, BHW)
    xa = jnp.concatenate([x, jnp.ones((1, BHW), jnp.float32)], axis=0)
    out = pl.pallas_call(
        mbconv_kernel,
        out_shape=jax.ShapeDtypeStruct((B * COUT, HW), jnp.float32),
        grid=(1,),                                   # single step: no grid overhead
        in_specs=[
            pl.BlockSpec((CIN + 1, BHW), lambda i: (0, 0)),
            pl.BlockSpec((CMID, CIN + 1), lambda i: (0, 0)),
            pl.BlockSpec((COUT, CMID), lambda i: (0, 0)),
            pl.BlockSpec((CMID, NPCOL), lambda i: (0, 0)),
        ],
        out_specs=pl.BlockSpec((B * COUT, HW), lambda i: (0, 0)),
        compiler_params=pltpu.CompilerParams(
            dimension_semantics=("arbitrary",)),
    )(xa, kp['w_exp_aug'], kp['w_proj_k'], kp['pcols'])
    return out.reshape(B, COUT, H, W)                # pure reshape -> NCHW


# ------------------------- deterministic parameters -------------------------
def init_params(key):
    ks = jax.random.split(key, 20)

    def bn(kg, kb, km, kv, c):
        gamma = 1.0 + 0.1 * jax.random.normal(kg, (c,), jnp.float32)
        beta = 0.1 * jax.random.normal(kb, (c,), jnp.float32)
        mean = 0.05 * jax.random.normal(km, (c,), jnp.float32)
        var = 1.0 + 0.1 * jax.random.uniform(kv, (c,), jnp.float32)
        scale = gamma / jnp.sqrt(var + BN_EPS)
        bias = beta - mean * scale
        return scale.reshape(1, c), bias.reshape(1, c)

    w_exp = 0.2 * jax.random.normal(ks[0], (CIN, CMID), jnp.float32)
    bn0_s, bn0_b = bn(ks[1], ks[2], ks[3], ks[4], CMID)
    w_dw = 0.2 * jax.random.normal(ks[5], (K, K, CMID), jnp.float32)
    bn1_s, bn1_b = bn(ks[6], ks[7], ks[8], ks[9], CMID)
    w_sr = 0.2 * jax.random.normal(ks[10], (CMID, CSQ), jnp.float32)
    b_sr = 0.1 * jax.random.normal(ks[11], (1, CSQ), jnp.float32)
    w_se = 0.2 * jax.random.normal(ks[12], (CSQ, CMID), jnp.float32)
    b_se = 0.1 * jax.random.normal(ks[13], (1, CMID), jnp.float32)
    w_proj = 0.2 * jax.random.normal(ks[14], (CMID, COUT), jnp.float32)
    bn2_s, bn2_b = bn(ks[15], ks[16], ks[17], ks[18], COUT)
    return dict(w_exp=w_exp, bn0_s=bn0_s, bn0_b=bn0_b, w_dw=w_dw,
                bn1_s=bn1_s, bn1_b=bn1_b, w_sr=w_sr, b_sr=b_sr,
                w_se=w_se, b_se=b_se, w_proj=w_proj,
                bn2_s=bn2_s, bn2_b=bn2_b)


def pack_params(p):
    """Fold BN scales into conv weights, fold the BN0 bias into an extra
    w_exp column, and pack the remaining small per-channel vectors into one
    (CMID, NPCOL) matrix (one DMA instead of ~12)."""
    w_exp_aug = jnp.concatenate(
        [p['w_exp'].T * p['bn0_s'].reshape(CMID, 1),
         p['bn0_b'].reshape(CMID, 1)], axis=1)                 # (CMID, CIN+1)
    w_proj_k = p['w_proj'].T * p['bn2_s'].reshape(COUT, 1)     # (COUT, CMID)
    cols = []
    for kh in range(K):
        for kw in range(K):
            cols.append(p['w_dw'][kh, kw, :] * p['bn1_s'][0])  # bn1 folded
    cols.append(p['bn1_b'][0])
    cols.append(p['b_se'][0])
    cols.append(jnp.zeros((CMID,), jnp.float32).at[:COUT].set(p['bn2_b'][0]))
    cols.append(jnp.zeros((CMID,), jnp.float32).at[:CSQ].set(p['b_sr'][0]))
    cols.append(p['w_sr'][:, 0])
    cols.append(p['w_se'][0, :])
    while len(cols) < NPCOL:
        cols.append(jnp.zeros((CMID,), jnp.float32))
    pcols = jnp.stack(cols, axis=1).astype(jnp.float32)        # (CMID, NPCOL)
    return dict(w_exp_aug=w_exp_aug, w_proj_k=w_proj_k, pcols=pcols)


# ------------------------- pure-JAX reference -------------------------
def reference(x_nchw, p):
    x = jnp.transpose(x_nchw, (0, 2, 3, 1))
    dn = ('NHWC', 'HWIO', 'NHWC')
    h = lax.conv_general_dilated(x, p['w_exp'].reshape(1, 1, CIN, CMID),
                                 (1, 1), 'SAME', dimension_numbers=dn)
    h = h * p['bn0_s'][0] + p['bn0_b'][0]
    h = h * jax.nn.sigmoid(h)
    h = lax.conv_general_dilated(h, p['w_dw'].reshape(K, K, 1, CMID),
                                 (1, 1), 'SAME', dimension_numbers=dn,
                                 feature_group_count=CMID)
    h = h * p['bn1_s'][0] + p['bn1_b'][0]
    h = h * jax.nn.sigmoid(h)
    pooled = jnp.mean(h, axis=(1, 2), keepdims=True)
    sq = jnp.einsum('bhwc,cs->bhws', pooled, p['w_sr']) + p['b_sr'][0]
    sq = sq * jax.nn.sigmoid(sq)
    ex = jnp.einsum('bhws,sc->bhwc', sq, p['w_se']) + p['b_se'][0]
    h = h * jax.nn.sigmoid(ex)
    y = lax.conv_general_dilated(h, p['w_proj'].reshape(1, 1, CMID, COUT),
                                 (1, 1), 'SAME', dimension_numbers=dn)
    y = y * p['bn2_s'][0] + p['bn2_b'][0]
    y = y + x
    return jnp.transpose(y, (0, 3, 1, 2))


if __name__ == "__main__":
    key = jax.random.PRNGKey(0)
    k_x, k_p = jax.random.split(key)
    x = jax.random.normal(k_x, (B, CIN, H, W), jnp.float32)   # NCHW like PyTorch
    params = init_params(k_p)
    kparams = pack_params(params)

    out = mbconv_forward(x, kparams)
    out = jax.block_until_ready(out)

    ref = jax.block_until_ready(reference(x, params))
    np.testing.assert_allclose(np.asarray(out), np.asarray(ref),
                               rtol=1e-4, atol=1e-4)
    print("KERNEL_OK")
</pallas_src>

<mosaic_0001>
module attributes {stable_mosaic.version = 11 : i64} {
  func.func @mbconv_kernel(%arg0: i32, %arg1: memref<5x512xf32, #tpu.memory_space<vmem>>, %arg2: memref<24x5xf32, #tpu.memory_space<vmem>>, %arg3: memref<4x24xf32, #tpu.memory_space<vmem>>, %arg4: memref<24x16xf32, #tpu.memory_space<vmem>>, %arg5: memref<8x256xf32, #tpu.memory_space<vmem>>) attributes {dimension_semantics = [#tpu.dimension_semantics<arbitrary>], iteration_bounds = array<i64: 1>, scalar_prefetch = 0 : i64, scratch_operands = 0 : i64, tpu.core_type = #tpu.core_type<tc>, window_params = [{pipeline_mode = #tpu.pipeline_mode<synchronous>, transform_indices = @transform_0, window_bounds = array<i64: 5, 512>}, {pipeline_mode = #tpu.pipeline_mode<synchronous>, transform_indices = @transform_1, window_bounds = array<i64: 24, 5>}, {pipeline_mode = #tpu.pipeline_mode<synchronous>, transform_indices = @transform_2, window_bounds = array<i64: 4, 24>}, {pipeline_mode = #tpu.pipeline_mode<synchronous>, transform_indices = @transform_3, window_bounds = array<i64: 24, 16>}, {pipeline_mode = #tpu.pipeline_mode<synchronous>, transform_indices = @transform_4, window_bounds = array<i64: 8, 256>}]} {
    %c0 = arith.constant 0 : index
    %c0_0 = arith.constant 0 : index
    %0 = vector.load %arg1[%c0, %c0_0] : memref<5x512xf32, #tpu.memory_space<vmem>>, vector<5x512xf32>
    %c0_1 = arith.constant 0 : index
    %c0_2 = arith.constant 0 : index
    %1 = vector.load %arg4[%c0_1, %c0_2] : memref<24x16xf32, #tpu.memory_space<vmem>>, vector<24x16xf32>
    %c0_3 = arith.constant 0 : index
    %c0_4 = arith.constant 0 : index
    %2 = vector.load %arg2[%c0_3, %c0_4] : memref<24x5xf32, #tpu.memory_space<vmem>>, vector<24x5xf32>
    %cst = arith.constant dense<0.000000e+00> : vector<24x512xf32>
    %3 = tpu.matmul %2, %0, %cst {dimension_numbers = #tpu.dot_dimension_numbers<[1], [0], [0], [1], [0, 0, 1, 1], [], []>} : vector<24x5xf32>, vector<5x512xf32>, vector<24x512xf32> -> vector<24x512xf32>
    %4 = arith.negf %3 : vector<24x512xf32>
    %5 = math.exp %4 : vector<24x512xf32>
    %cst_5 = arith.constant 1.000000e+00 : f32
    %6 = vector.broadcast %cst_5 : f32 to vector<24x512xf32>
    %7 = arith.addf %6, %5 : vector<24x512xf32>
    %8 = arith.divf %6, %7 : vector<24x512xf32>
    %9 = arith.mulf %3, %8 : vector<24x512xf32>
    %10 = tpu.iota {dimensions = array<i32: 1>} : vector<1x512xi32>
    %c255_i32 = arith.constant 255 : i32
    %11 = vector.broadcast %c255_i32 : i32 to vector<1x512xi32>
    %12 = arith.andi %10, %11 : vector<1x512xi32>
    %c15_i32 = arith.constant 15 : i32
    %13 = vector.broadcast %c15_i32 : i32 to vector<1x512xi32>
    %14 = arith.andi %12, %13 : vector<1x512xi32>
    %c16_i32 = arith.constant 16 : i32
    %15 = vector.broadcast %c16_i32 : i32 to vector<1x512xi32>
    %16 = arith.cmpi sge, %12, %15 : vector<1x512xi32>
    %c240_i32 = arith.constant 240 : i32
    %17 = vector.broadcast %c240_i32 : i32 to vector<1x512xi32>
    %18 = arith.cmpi slt, %12, %17 : vector<1x512xi32>
    %c1_i32 = arith.constant 1 : i32
    %19 = vector.broadcast %c1_i32 : i32 to vector<1x512xi32>
    %20 = arith.cmpi sge, %14, %19 : vector<1x512xi32>
    %c14_i32 = arith.constant 14 : i32
    %21 = vector.broadcast %c14_i32 : i32 to vector<1x512xi32>
    %22 = arith.cmpi sle, %14, %21 : vector<1x512xi32>
    %23 = vector.extract_strided_slice %1 {offsets = [0, 4], sizes = [24, 1], strides = [1, 1]} : vector<24x16xf32> to vector<24x1xf32>
    %24 = vector.broadcast %23 : vector<24x1xf32> to vector<24x512xf32>
    %25 = arith.mulf %9, %24 : vector<24x512xf32>
    %26 = vector.extract_strided_slice %1 {offsets = [0, 9], sizes = [24, 1], strides = [1, 1]} : vector<24x16xf32> to vector<24x1xf32>
    %27 = vector.broadcast %26 : vector<24x1xf32> to vector<24x512xf32>
    %28 = arith.addf %25, %27 : vector<24x512xf32>
    %c17_i32 = arith.constant 17 : i32
    %29 = tpu.dynamic_rotate %9 by %c17_i32 dim 1 : vector<24x512xf32>, i32 -> vector<24x512xf32>
    %30 = arith.andi %16, %20 : vector<1x512xi1>
    %cst_6 = arith.constant 0.000000e+00 : f32
    %31 = vector.shape_cast %30 : vector<1x512xi1> to vector<1x512xi1>
    %32 = vector.broadcast %31 : vector<1x512xi1> to vector<24x512xi1>
    %33 = vector.broadcast %cst_6 : f32 to vector<24x512xf32>
    %34 = arith.select %32, %29, %33 : vector<24x512xi1>, vector<24x512xf32>
    %35 = vector.extract_strided_slice %1 {offsets = [0, 0], sizes = [24, 1], strides = [1, 1]} : vector<24x16xf32> to vector<24x1xf32>
    %36 = vector.broadcast %35 : vector<24x1xf32> to vector<24x512xf32>
    %37 = arith.mulf %34, %36 : vector<24x512xf32>
    %38 = arith.addf %28, %37 : vector<24x512xf32>
    %c16_i32_7 = arith.constant 16 : i32
    %39 = tpu.dynamic_rotate %9 by %c16_i32_7 dim 1 : vector<24x512xf32>, i32 -> vector<24x512xf32>
    %cst_8 = arith.constant 0.000000e+00 : f32
    %40 = vector.shape_cast %16 : vector<1x512xi1> to vector<1x512xi1>
    %41 = vector.broadcast %40 : vector<1x512xi1> to vector<24x512xi1>
    %42 = vector.broadcast %cst_8 : f32 to vector<24x512xf32>
    %43 = arith.select %41, %39, %42 : vector<24x512xi1>, vector<24x512xf32>
    %44 = vector.extract_strided_slice %1 {offsets = [0, 1], sizes = [24, 1], strides = [1, 1]} : vector<24x16xf32> to vector<24x1xf32>
    %45 = vector.broadcast %44 : vector<24x1xf32> to vector<24x512xf32>
    %46 = arith.mulf %43, %45 : vector<24x512xf32>
    %47 = arith.addf %38, %46 : vector<24x512xf32>
    %c15_i32_9 = arith.constant 15 : i32
    %48 = tpu.dynamic_rotate %9 by %c15_i32_9 dim 1 : vector<24x512xf32>, i32 -> vector<24x512xf32>
    %49 = arith.andi %16, %22 : vector<1x512xi1>
    %cst_10 = arith.constant 0.000000e+00 : f32
    %50 = vector.shape_cast %49 : vector<1x512xi1> to vector<1x512xi1>
    %51 = vector.broadcast %50 : vector<1x512xi1> to vector<24x512xi1>
    %52 = vector.broadcast %cst_10 : f32 to vector<24x512xf32>
    %53 = arith.select %51, %48, %52 : vector<24x512xi1>, vector<24x512xf32>
    %54 = vector.extract_strided_slice %1 {offsets = [0, 2], sizes = [24, 1], strides = [1, 1]} : vector<24x16xf32> to vector<24x1xf32>
    %55 = vector.broadcast %54 : vector<24x1xf32> to vector<24x512xf32>
    %56 = arith.mulf %53, %55 : vector<24x512xf32>
    %57 = arith.addf %47, %56 : vector<24x512xf32>
    %c1_i32_11 = arith.constant 1 : i32
    %58 = tpu.dynamic_rotate %9 by %c1_i32_11 dim 1 : vector<24x512xf32>, i32 -> vector<24x512xf32>
    %cst_12 = arith.constant 0.000000e+00 : f32
    %59 = vector.shape_cast %20 : vector<1x512xi1> to vector<1x512xi1>
    %60 = vector.broadcast %59 : vector<1x512xi1> to vector<24x512xi1>
    %61 = vector.broadcast %cst_12 : f32 to vector<24x512xf32>
    %62 = arith.select %60, %58, %61 : vector<24x512xi1>, vector<24x512xf32>
    %63 = vector.extract_strided_slice %1 {offsets = [0, 3], sizes = [24, 1], strides = [1, 1]} : vector<24x16xf32> to vector<24x1xf32>
    %64 = vector.broadcast %63 : vector<24x1xf32> to vector<24x512xf32>
    %65 = arith.mulf %62, %64 : vector<24x512xf32>
    %66 = arith.addf %57, %65 : vector<24x512xf32>
    %c511_i32 = arith.constant 511 : i32
    %67 = tpu.dynamic_rotate %9 by %c511_i32 dim 1 : vector<24x512xf32>, i32 -> vector<24x512xf32>
    %cst_13 = arith.constant 0.000000e+00 : f32
    %68 = vector.shape_cast %22 : vector<1x512xi1> to vector<1x512xi1>
    %69 = vector.broadcast %68 : vector<1x512xi1> to vector<24x512xi1>
    %70 = vector.broadcast %cst_13 : f32 to vector<24x512xf32>
    %71 = arith.select %69, %67, %70 : vector<24x512xi1>, vector<24x512xf32>
    %72 = vector.extract_strided_slice %1 {offsets = [0, 5], sizes = [24, 1], strides = [1, 1]} : vector<24x16xf32> to vector<24x1xf32>
    %73 = vector.broadcast %72 : vector<24x1xf32> to vector<24x512xf32>
    %74 = arith.mulf %71, %73 : vector<24x512xf32>
    %75 = arith.addf %66, %74 : vector<24x512xf32>
    %c497_i32 = arith.constant 497 : i32
    %76 = tpu.dynamic_rotate %9 by %c497_i32 dim 1 : vector<24x512xf32>, i32 -> vector<24x512xf32>
    %77 = arith.andi %18, %20 : vector<1x512xi1>
    %cst_14 = arith.constant 0.000000e+00 : f32
    %78 = vector.shape_cast %77 : vector<1x512xi1> to vector<1x512xi1>
    %79 = vector.broadcast %78 : vector<1x512xi1> to vector<24x512xi1>
    %80 = vector.broadcast %cst_14 : f32 to vector<24x512xf32>
    %81 = arith.select %79, %76, %80 : vector<24x512xi1>, vector<24x512xf32>
    %82 = vector.extract_strided_slice %1 {offsets = [0, 6], sizes = [24, 1], strides = [1, 1]} : vector<24x16xf32> to vector<24x1xf32>
    %83 = vector.broadcast %82 : vector<24x1xf32> to vector<24x512xf32>
    %84 = arith.mulf %81, %83 : vector<24x512xf32>
    %85 = arith.addf %75, %84 : vector<24x512xf32>
    %c496_i32 = arith.constant 496 : i32
    %86 = tpu.dynamic_rotate %9 by %c496_i32 dim 1 : vector<24x512xf32>, i32 -> vector<24x512xf32>
    %cst_15 = arith.constant 0.000000e+00 : f32
    %87 = vector.shape_cast %18 : vector<1x512xi1> to vector<1x512xi1>
    %88 = vector.broadcast %87 : vector<1x512xi1> to vector<24x512xi1>
    %89 = vector.broadcast %cst_15 : f32 to vector<24x512xf32>
    %90 = arith.select %88, %86, %89 : vector<24x512xi1>, vector<24x512xf32>
    %91 = vector.extract_strided_slice %1 {offsets = [0, 7], sizes = [24, 1], strides = [1, 1]} : vector<24x16xf32> to vector<24x1xf32>
    %92 = vector.broadcast %91 : vector<24x1xf32> to vector<24x512xf32>
    %93 = arith.mulf %90, %92 : vector<24x512xf32>
    %94 = arith.addf %85, %93 : vector<24x512xf32>
    %c495_i32 = arith.constant 495 : i32
    %95 = tpu.dynamic_rotate %9 by %c495_i32 dim 1 : vector<24x512xf32>, i32 -> vector<24x512xf32>
    %96 = arith.andi %18, %22 : vector<1x512xi1>
    %cst_16 = arith.constant 0.000000e+00 : f32
    %97 = vector.shape_cast %96 : vector<1x512xi1> to vector<1x512xi1>
    %98 = vector.broadcast %97 : vector<1x512xi1> to vector<24x512xi1>
    %99 = vector.broadcast %cst_16 : f32 to vector<24x512xf32>
    %100 = arith.select %98, %95, %99 : vector<24x512xi1>, vector<24x512xf32>
    %101 = vector.extract_strided_slice %1 {offsets = [0, 8], sizes = [24, 1], strides = [1, 1]} : vector<24x16xf32> to vector<24x1xf32>
    %102 = vector.broadcast %101 : vector<24x1xf32> to vector<24x512xf32>
    %103 = arith.mulf %100, %102 : vector<24x512xf32>
    %104 = arith.addf %94, %103 : vector<24x512xf32>
    %105 = arith.negf %104 : vector<24x512xf32>
    %106 = math.exp %105 : vector<24x512xf32>
    %cst_17 = arith.constant 1.000000e+00 : f32
    %107 = vector.broadcast %cst_17 : f32 to vector<24x512xf32>
    %108 = arith.addf %107, %106 : vector<24x512xf32>
    %109 = arith.divf %107, %108 : vector<24x512xf32>
    %110 = arith.mulf %104, %109 : vector<24x512xf32>
    %111 = vector.extract_strided_slice %110 {offsets = [0, 0], sizes = [24, 256], strides = [1, 1]} : vector<24x512xf32> to vector<24x256xf32>
    %cst_18 = arith.constant dense<0.000000e+00> : vector<24xf32>
    %112 = vector.multi_reduction <add>, %111, %cst_18 [1] : vector<24x256xf32> to vector<24xf32>
    %113 = vector.shape_cast %112 : vector<24xf32> to vector<24x1xf32>
    %114 = vector.extract_strided_slice %110 {offsets = [0, 256], sizes = [24, 256], strides = [1, 1]} : vector<24x512xf32> to vector<24x256xf32>
    %cst_19 = arith.constant dense<0.000000e+00> : vector<24xf32>
    %115 = vector.multi_reduction <add>, %114, %cst_19 [1] : vector<24x256xf32> to vector<24xf32>
    %116 = vector.shape_cast %115 : vector<24xf32> to vector<24x1xf32>
    %117 = tpu.concatenate %113, %116 in 1 : vector<24x1xf32>, vector<24x1xf32> -> vector<24x2xf32>
    %cst_20 = arith.constant 3.906250e-03 : f32
    %118 = vector.broadcast %cst_20 : f32 to vector<24x2xf32>
    %119 = arith.mulf %117, %118 : vector<24x2xf32>
    %120 = vector.extract_strided_slice %1 {offsets = [0, 13], sizes = [24, 1], strides = [1, 1]} : vector<24x16xf32> to vector<24x1xf32>
    %121 = vector.broadcast %120 : vector<24x1xf32> to vector<24x2xf32>
    %122 = arith.mulf %119, %121 : vector<24x2xf32>
    %cst_21 = arith.constant dense<0.000000e+00> : vector<2xf32>
    %123 = vector.multi_reduction <add>, %122, %cst_21 [0] : vector<24x2xf32> to vector<2xf32>
    %124 = vector.shape_cast %123 : vector<2xf32> to vector<1x2xf32>
    %125 = vector.extract_strided_slice %1 {offsets = [0, 12], sizes = [1, 1], strides = [1, 1]} : vector<24x16xf32> to vector<1x1xf32>
    %126 = vector.broadcast %125 : vector<1x1xf32> to vector<1x2xf32>
    %127 = arith.addf %124, %126 : vector<1x2xf32>
    %128 = arith.negf %127 : vector<1x2xf32>
    %129 = math.exp %128 : vector<1x2xf32>
    %cst_22 = arith.constant 1.000000e+00 : f32
    %130 = vector.broadcast %cst_22 : f32 to vector<1x2xf32>
    %131 = arith.addf %130, %129 : vector<1x2xf32>
    %132 = arith.divf %130, %131 : vector<1x2xf32>
    %133 = arith.mulf %127, %132 : vector<1x2xf32>
    %134 = vector.extract_strided_slice %1 {offsets = [0, 14], sizes = [24, 1], strides = [1, 1]} : vector<24x16xf32> to vector<24x1xf32>
    %135 = vector.broadcast %133 : vector<1x2xf32> to vector<24x2xf32>
    %136 = vector.broadcast %134 : vector<24x1xf32> to vector<24x2xf32>
    %137 = arith.mulf %135, %136 : vector<24x2xf32>
    %138 = vector.extract_strided_slice %1 {offsets = [0, 10], sizes = [24, 1], strides = [1, 1]} : vector<24x16xf32> to vector<24x1xf32>
    %139 = vector.broadcast %138 : vector<24x1xf32> to vector<24x2xf32>
    %140 = arith.addf %137, %139 : vector<24x2xf32>
    %141 = arith.negf %140 : vector<24x2xf32>
    %142 = math.exp %141 : vector<24x2xf32>
    %cst_23 = arith.constant 1.000000e+00 : f32
    %143 = vector.broadcast %cst_23 : f32 to vector<24x2xf32>
    %144 = arith.addf %143, %142 : vector<24x2xf32>
    %145 = arith.divf %143, %144 : vector<24x2xf32>
    %146 = vector.extract_strided_slice %145 {offsets = [0, 0], sizes = [24, 1], strides = [1, 1]} : vector<24x2xf32> to vector<24x1xf32>
    %c256_i32 = arith.constant 256 : i32
    %147 = vector.broadcast %c256_i32 : i32 to vector<1x512xi32>
    %148 = arith.cmpi sge, %10, %147 : vector<1x512xi32>
    %149 = vector.extract_strided_slice %145 {offsets = [0, 1], sizes = [24, 1], strides = [1, 1]} : vector<24x2xf32> to vector<24x1xf32>
    %150 = vector.shape_cast %148 : vector<1x512xi1> to vector<1x512xi1>
    %151 = vector.broadcast %150 : vector<1x512xi1> to vector<24x512xi1>
    %152 = vector.shape_cast %149 : vector<24x1xf32> to vector<24x1xf32>
    %153 = vector.broadcast %152 : vector<24x1xf32> to vector<24x512xf32>
    %154 = vector.shape_cast %146 : vector<24x1xf32> to vector<24x1xf32>
    %155 = vector.broadcast %154 : vector<24x1xf32> to vector<24x512xf32>
    %156 = arith.select %151, %153, %155 : vector<24x512xi1>, vector<24x512xf32>
    %157 = arith.mulf %110, %156 : vector<24x512xf32>
    %c0_24 = arith.constant 0 : index
    %c0_25 = arith.constant 0 : index
    %158 = vector.load %arg3[%c0_24, %c0_25] : memref<4x24xf32, #tpu.memory_space<vmem>>, vector<4x24xf32>
    %cst_26 = arith.constant dense<0.000000e+00> : vector<4x512xf32>
    %159 = tpu.matmul %158, %157, %cst_26 {dimension_numbers = #tpu.dot_dimension_numbers<[1], [0], [0], [1], [0, 0, 1, 1], [], []>} : vector<4x24xf32>, vector<24x512xf32>, vector<4x512xf32> -> vector<4x512xf32>
    %160 = vector.extract_strided_slice %1 {offsets = [0, 11], sizes = [4, 1], strides = [1, 1]} : vector<24x16xf32> to vector<4x1xf32>
    %161 = vector.broadcast %160 : vector<4x1xf32> to vector<4x512xf32>
    %162 = arith.addf %159, %161 : vector<4x512xf32>
    %163 = vector.extract_strided_slice %0 {offsets = [0, 0], sizes = [4, 512], strides = [1, 1]} : vector<5x512xf32> to vector<4x512xf32>
    %164 = arith.addf %162, %163 : vector<4x512xf32>
    %165 = vector.extract_strided_slice %164 {offsets = [0, 0], sizes = [4, 256], strides = [1, 1]} : vector<4x512xf32> to vector<4x256xf32>
    %166 = vector.extract_strided_slice %164 {offsets = [0, 256], sizes = [4, 256], strides = [1, 1]} : vector<4x512xf32> to vector<4x256xf32>
    %167 = tpu.concatenate %165, %166 in 0 : vector<4x256xf32>, vector<4x256xf32> -> vector<8x256xf32>
    %c0_27 = arith.constant 0 : index
    %c0_28 = arith.constant 0 : index
    %168 = vector.load %arg5[%c0_27, %c0_28] : memref<8x256xf32, #tpu.memory_space<vmem>>, vector<8x256xf32>
    tpu.vector_store %arg5[%c0_27, %c0_28], %167 {strides = array<i32>} : memref<8x256xf32, #tpu.memory_space<vmem>>, vector<8x256xf32>,
    return
  }
  func.func @transform_0(%arg0: i32) -> (i32, i32) {
    %c0_i32 = arith.constant 0 : i32
    %c0_i32_0 = arith.constant 0 : i32
    %c0_i32_1 = arith.constant 0 : i32
    return %c0_i32, %c0_i32_0 : i32, i32
  }
  func.func @transform_1(%arg0: i32) -> (i32, i32) {
    %c0_i32 = arith.constant 0 : i32
    %c0_i32_0 = arith.constant 0 : i32
    %c0_i32_1 = arith.constant 0 : i32
    return %c0_i32, %c0_i32_0 : i32, i32
  }
  func.func @transform_2(%arg0: i32) -> (i32, i32) {
    %c0_i32 = arith.constant 0 : i32
    %c0_i32_0 = arith.constant 0 : i32
    %c0_i32_1 = arith.constant 0 : i32
    return %c0_i32, %c0_i32_0 : i32, i32
  }
  func.func @transform_3(%arg0: i32) -> (i32, i32) {
    %c0_i32 = arith.constant 0 : i32
    %c0_i32_0 = arith.constant 0 : i32
    %c0_i32_1 = arith.constant 0 : i32
    return %c0_i32, %c0_i32_0 : i32, i32
  }
  func.func @transform_4(%arg0: i32) -> (i32, i32) {
    %c0_i32 = arith.constant 0 : i32
    %c0_i32_0 = arith.constant 0 : i32
    %c0_i32_1 = arith.constant 0 : i32
    return %c0_i32, %c0_i32_0 : i32, i32
  }
}

</mosaic_0001>

<bundles_post_ra>
// kernel: tpu_custom_call.1
= control target key start
LH: loop header
LB: loop body
LE: loop exit
PB: predicated region body
PF: predicated region fallthrough
CT: control target
= control target key end

     0   :  { %vm38_vm0 = vcmask 1044480   ;;  %vm28_vm1 = vcmask 39936   ;;  %s3890_s0 = inlined_call_operand.vmem [shape: f32[5,512], index: 0, kind: input, shape index: {}]   ;;  %s3891_s1 = inlined_call_operand.vmem [shape: f32[24,5], index: 1, kind: input, shape index: {}]   ;;  %s3892_s2 = inlined_call_operand.vmem [shape: f32[4,24], index: 2, kind: input, shape index: {}]   ;;  %s3893_s3 = inlined_call_operand.vmem [shape: f32[24,16], index: 3, kind: input, shape index: {}]   ;;  %s3894_s4 = inlined_call_operand.hbm [shape: f32[8,256], index: 4, kind: output, shape index: {}]  }
   0x1   :  { %v18_v0 = vld [vmem:[%s3890_s0] sm:$0x1f]  ;;  %v19_v1 = vld [vmem:[%s3890_s0 + $0x8] sm:$0x1f]  ;;  %v20_v3 = vld [vmem:[%s3890_s0 + $0x10] sm:$0x1f] }
   0x2   :  { %v25_v2 = vld [vmem:[%s3891_s1] sm:$0xff]  ;;  %1823 = vmatpush.msk.msra.mxu0 %vm38_vm0, %v18_v0  ;;  %1827 = vmatpush.msk.msra.mxu1 %vm38_vm0, %v19_v1  ;;  %v21_v4 = vld [vmem:[%s3890_s0 + $0x18] sm:$0x1f]  ;;  %v2152_v5 = vld [vmem:[%s3893_s3 + $0x10] sm:$0xff] }
   0x3   :  { %1831 = vmatpush.msk.msra.mxu2 %vm38_vm0, %v20_v3  ;;  %1835 = vmatpush.msk.msra.mxu3 %vm38_vm0, %v21_v4  ;;  %v2157_v6 = vld [vmem:[%s3893_s3] sm:$0xff] }
   0x4   :  { %1824 = vmatmul.msk.f32.vlgmr.msra.gmra.mxu0 %vm28_vm1, %v25_v2  ;;  %1828 = vmatmul.msk.f32.vlgmr.msra.gmra.mxu1 %vm28_vm1, %v25_v2 }
   0x5   :  { %9 = vsyncpa [#allocation3], 0  ;;  %1832 = vmatmul.msk.f32.vlgmr.msra.gmra.mxu2 %vm28_vm1, %v25_v2  ;;  %1836 = vmatmul.msk.f32.vlgmr.msra.gmra.mxu3 %vm28_vm1, %v25_v2  ;;  %v2083_v7 = vmov 4   ;;  %v2166_v8 = vld [vmem:[%s3893_s3 + $0x8] sm:$0xff]  ;;  %v2084_v9 = vmov 9   ;;  %v27_v11 = vld [vmem:[%s3891_s1 + $0x10] sm:$0xff] }
   0x6   :  { %1896 = vset.pattern.permute.xlu1 %v2083_v7  ;;  %1895 = vset.pattern.permute.xlu0 %v2083_v7  ;;  %v26_v10 = vld [vmem:[%s3891_s1 + $0x8] sm:$0xff]  ;;  %v3897_v12 = vmov 0   ;;  %v3895_v13 = vmov 1   ;;  %v2087_v14 = vmov 2   ;;  %s2088_s1 = smov 16   ;;  %s2089_s9 = smov 17  }
   0x7   :  { %436 = vperm.xlu1 %1896, %v2152_v5   ;;  %426 = vperm.xlu0 %1895, %v2157_v6   ;;  %s2090_s10 = smov 15   ;;  %s2091_s11 = smov 1  }
   0x8   :  { %1898 = vset.pattern.permute.xlu2 %v2084_v9  ;;  %s2093_s12 = smov 127   ;;  %s2095_s13 = smov 113  }
   0x9   :  { %456 = vperm.xlu2 %1898, %v2166_v8   ;;  %s2097_s18 = smov 112   ;;  %s2099_s21 = smov 111  }
   0xa   :  { %s2106_s6 = smov [#allocation2]  }
   0xb   :  { %s1812_s7 = sshll.u32 %s2106_s6, 4  ;;  %s1813_s7 = int_to_ptr.vmem [resolvable:$true] %s1812_s7 }
   0xc   :  { %1825 = vmatmul.msk.f32.gmra.mxu0 %vm28_vm1, %v26_v10  ;;  %1829 = vmatmul.msk.f32.gmra.mxu1 %vm28_vm1, %v26_v10 }
   0xd   :  { %1833 = vmatmul.msk.f32.gmra.mxu2 %vm28_vm1, %v26_v10  ;;  %1837 = vmatmul.msk.f32.gmra.mxu3 %vm28_vm1, %v26_v10 }
   0xf   :  { %1897 = vset.pattern.permute.xlu1 %v2084_v9  ;;  %431 = vperm.xlu0 %1895, %v2166_v8  }
  0x10   :  { %452 = vperm.xlu1 %1897, %v2157_v6  }
  0x11   :  { %460 = vperm.xlu2 %1898, %v2152_v5  }
  0x14   :  { %1826 = vmatmul.msk.f32.gmra.mxu0 %vm28_vm1, %v27_v11  ;;  %1830 = vmatmul.msk.f32.gmra.mxu1 %vm28_vm1, %v27_v11 }
  0x15   :  { %1834 = vmatmul.msk.f32.gmra.mxu2 %vm28_vm1, %v27_v11  ;;  %1838 = vmatmul.msk.f32.gmra.mxu3 %vm28_vm1, %v27_v11 }
  0x17   :  { %1899 = vset.pattern.permute.xlu0 %v3897_v12 }
  0x18   :  { %1900 = vset.pattern.permute.xlu1 %v3897_v12  ;;  %537 = vperm.xlu0 %1899, %v2157_v6  }
  0x19   :  { %1901 = vset.pattern.permute.xlu2 %v3897_v12  ;;  %541 = vperm.xlu1 %1900, %v2166_v8  }
  0x1a   :  { %545 = vperm.xlu2 %1901, %v2152_v5  }
  0x20   :  { %1904 = vset.pattern.permute.xlu0 %v3895_v13 }
  0x21   :  { %1902 = vset.pattern.permute.xlu1 %v3895_v13  ;;  %638 = vperm.xlu0 %1904, %v2152_v5  }
  0x22   :  { %1903 = vset.pattern.permute.xlu2 %v3895_v13  ;;  %630 = vperm.xlu1 %1902, %v2157_v6  }
  0x23   :  { %634 = vperm.xlu2 %1903, %v2166_v8  }
  0x29   :  { %1906 = vset.pattern.permute.xlu0 %v2087_v14 }
  0x2a   :  { %1907 = vset.pattern.permute.xlu1 %v2087_v14  ;;  %731 = vperm.xlu0 %1906, %v2166_v8  }
  0x2b   :  { %1905 = vset.pattern.permute.xlu2 %v2087_v14  ;;  %735 = vperm.xlu1 %1907, %v2152_v5  }
  0x2c   :  { %727 = vperm.xlu2 %1905, %v2157_v6  }
  0x81   :  { %v2201_v15 = vpop.f32.mrf.mxu0  ;;  %v2203_v16 = vpop.f32.mrf.mxu1 }
  0x82   :  { %v1839_v17 = vmul.f32 -1.442695, %v2201_v15  ;;  %v1840_v18 = vmul.f32 -1.442695, %v2203_v16 }
  0x84   :  { %1935 = vpow2.f32 %v1839_v17 }
  0x85   :  { %1937 = vpow2.f32 %v1840_v18 }
  0x88   :  { %v2207_v19 = vpop.f32.mrf.mxu2  ;;  %v2209_v20 = vpop.f32.mrf.mxu3 }
  0x89   :  { %v1841_v21 = vmul.f32 -1.442695, %v2207_v19  ;;  %v1842_v22 = vmul.f32 -1.442695, %v2209_v20  ;;  %v2215_v30 = vpop.f32.mrf.mxu0  ;;  %v2217_v32 = vpop.f32.mrf.mxu1 }
  0x8a   :  { %v1936_v23 = vpop.eup %1935  ;;  %v1843_v37 = vmul.f32 -1.442695, %v2215_v30  ;;  %v1844_v39 = vmul.f32 -1.442695, %v2217_v32 }
  0x8b   :  { %v1938_v24 = vpop.eup %1937  ;;  %v191_v25 = vadd.f32 1.0, %v1936_v23  ;;  %1939 = vpow2.f32 %v1841_v21 }
  0x8c   :  { %v192_v26 = vadd.f32 1.0, %v1938_v24  ;;  %1941 = vpow2.f32 %v1842_v22 }
  0x8d   :  { %1943 = vrcp.f32 %v191_v25  ;;  %v212_v40 = vand.u32 2147483647, %v191_v25  ;;  %v214_v41 = vand.u32 2147483648, %v191_v25  ;;  %vm208_vm5 = vweird.f32 %v191_v25 }
  0x8e   :  { %1945 = vrcp.f32 %v192_v26  ;;  %vm223_vm2 = vweird.f32 %v192_v26  ;;  %v229_v44 = vand.u32 2147483648, %v192_v26  ;;  %v227_v46 = vand.u32 2147483647, %v192_v26 }
  0x8f   :  { %v215_v50 = vor.u32 1.1754944e-38, %v214_v41  ;;  %vm213_vm7 = vcmp.eq.f32.partialorder %v212_v40, 8.507059e+37 }
  0x90   :  { %v2225_v47 = vpop.f32.mrf.mxu2  ;;  %v230_v54 = vor.u32 1.1754944e-38, %v229_v44  ;;  %vm228_vm9 = vcmp.eq.f32.partialorder %v227_v46, 8.507059e+37  ;;  %v2246_v3 = vpop.f32.mrf.mxu3 }
  0x91   :  { %v1940_v27 = vpop.eup %1939  ;;  %v1845_v55 = vmul.f32 -1.442695, %v2225_v47  ;;  %v1846_v10 = vmul.f32 -1.442695, %v2246_v3 }
  0x92   :  { %v1942_v28 = vpop.eup %1941  ;;  %v2213_v29 = vadd.f32 1.0, %v1940_v27 }
  0x93   :  { %v1944_v31 = vpop.eup %1943  ;;  %v2220_v35 = vadd.f32 1.0, %v1942_v28 }
  0x94   :  { %v1946_v33 = vpop.eup %1945  ;;  %v204_v34 = vmul.f32 %v1944_v31, %v191_v25  ;;  %1947 = vrcp.f32 %v2213_v29  ;;  %vm209_vm3 = vweird.f32 %v1944_v31  ;;  %vm238_vm10 = vweird.f32 %v2213_v29 }
  0x95   :  { %v219_v36 = vmul.f32 %v1946_v33, %v192_v26  ;;  %1949 = vrcp.f32 %v2220_v35  ;;  %vm224_vm4 = vweird.f32 %v1946_v33  ;;  %vm210_vm6 = vmor %vm208_vm5, %vm209_vm3  ;;  %v244_v9 = vand.u32 2147483648, %v2213_v29 }
  0x96   :  { %v205_v38 = vsub.f32 1.0, %v204_v34  ;;  %1951 = vpow2.f32 %v1843_v37  ;;  %vm225_vm8 = vmor %vm223_vm2, %vm224_vm4  ;;  %v242_v14 = vand.u32 2147483647, %v2213_v29  ;;  %vm253_vm14 = vweird.f32 %v2220_v35 }
  0x97   :  { %v220_v42 = vsub.f32 1.0, %v219_v36  ;;  %1953 = vpow2.f32 %v1844_v39  ;;  %v245_v18 = vor.u32 1.1754944e-38, %v244_v9  ;;  %v259_v26 = vand.u32 2147483648, %v2220_v35  ;;  %v2301_v39 = vpop.f32.mrf.mxu0 }
  0x98   :  { %v206_v43 = vmul.f32 %v1944_v31, %v205_v38  ;;  %1955 = vpow2.f32 %v1845_v55  ;;  %vm243_vm13 = vcmp.eq.f32.partialorder %v242_v14, 8.507059e+37  ;;  %v1847_v44 = vmul.f32 -1.442695, %v2301_v39 }
  0x99   :  { %v221_v45 = vmul.f32 %v1946_v33, %v220_v42  ;;  %v260_v34 = vor.u32 1.1754944e-38, %v259_v26 }
  0x9a   :  { %v1948_v48 = vpop.eup %1947  ;;  %v207_v49 = vadd.f32 %v1944_v31, %v206_v43 }
  0x9b   :  { %v222_v51 = vadd.f32 %v1946_v33, %v221_v45  ;;  %v234_v52 = vmul.f32 %v1948_v48, %v2213_v29  ;;  %v2230_v59 = vpop.eup %1949  ;;  %vm239_vm11 = vweird.f32 %v1948_v48  ;;  %v257_v29 = vand.u32 2147483647, %v2220_v35 }
  0x9c   :  { %v211_v53 = vsel %vm210_vm6, %v1944_v31, %v207_v49  ;;  %v1952_v62 = vpop.eup %1951  ;;  %v249_v2 = vmul.f32 %v2230_v59, %v2220_v35  ;;  %vm2256_vm12 = vmor %vm238_vm10, %vm239_vm11  ;;  %vm254_vm15 = vweird.f32 %v2230_v59 }
  0x9d   :  { %v216_v56 = vsel %vm213_vm7, %v215_v50, %v211_v53  ;;  %v226_v57 = vsel %vm225_vm8, %v1946_v33, %v222_v51  ;;  %v235_v58 = vsub.f32 1.0, %v234_v52  ;;  %v1954_v0 = vpop.eup %1953  ;;  %v2248_v4 = vadd.f32 1.0, %v1952_v62  ;;  %vm255_vm0 = vmor %vm253_vm14, %vm254_vm15  ;;  %v2326_v52 = vpop.f32.mrf.mxu1 }
  0x9e   :  { %v2233_v60 = vmul.f32 %v216_v56, %v2201_v15  ;;  %v231_v61 = vsel %vm228_vm9, %v230_v54, %v226_v57  ;;  %v2251_v7 = vadd.f32 1.0, %v1954_v0  ;;  %v250_v15 = vsub.f32 1.0, %v249_v2 }
  0x9f   :  { %v2236_v63 = vmul.f32 %v231_v61, %v2203_v16  ;;  %v236_v1 = vmul.f32 %v1948_v48, %v235_v58  ;;  %v1956_v16 = vpop.eup %1955  ;;  %1957 = vrcp.f32 %v2248_v4  ;;  %vm258_vm1 = vcmp.eq.f32.partialorder %v257_v29, 8.507059e+37  ;;  %v2389_v29 = vpop.permute.xlu2 %456 }
  0xa0   :  { %3918 = vst [vmem:[#allocation5_spill] sm:$0xff] %v2233_v60  ;;  %572 = vrot.lane.b32.xlu1 %v2233_v60, %s2088_s1  ;;  %475 = vrot.lane.b32.xlu0 %v2233_v60, %s2089_s9  ;;  %1959 = vrcp.f32 %v2251_v7  ;;  %v251_v22 = vmul.f32 %v2230_v59, %v250_v15  ;;  %v2271_v23 = vadd.f32 1.0, %v1956_v16  ;;  %vm283_vm2 = vweird.f32 %v2251_v7 }
  0xa1   :  { %671 = vrot.lane.b32.xlu2 %v2236_v63, %s2090_s10  ;;  %v237_v11 = vadd.f32 %v1948_v48, %v236_v1  ;;  %1961 = vpow2.f32 %v1846_v10  ;;  %vm268_vm4 = vweird.f32 %v2248_v4  ;;  %v274_v50 = vand.u32 2147483648, %v2248_v4 }
  0xa2   :  { %v252_v28 = vadd.f32 %v2230_v59, %v251_v22  ;;  %1963 = vrcp.f32 %v2271_v23  ;;  %v289_v51 = vand.u32 2147483648, %v2251_v7  ;;  %v287_v54 = vand.u32 2147483647, %v2251_v7 }
  0xa3   :  { %v241_v21 = vsel %vm2256_vm12, %v1948_v48, %v237_v11  ;;  %v272_v56 = vand.u32 2147483647, %v2248_v4  ;;  %v1848_v62 = vmul.f32 -1.442695, %v2326_v52  ;;  %v275_v0 = vor.u32 1.1754944e-38, %v274_v50 }
  0xa4   :  { %v246_v25 = vsel %vm243_vm13, %v245_v18, %v241_v21  ;;  %v256_v37 = vsel %vm255_vm0, %v2230_v59, %v252_v28  ;;  %v290_v1 = vor.u32 1.1754944e-38, %v289_v51  ;;  %vm288_vm8 = vcmp.eq.f32.partialorder %v287_v54, 8.507059e+37 }
  0xa5   :  { %v2275_v24 = vpop.eup %1957  ;;  %v2284_v33 = vmul.f32 %v246_v25, %v2207_v19  ;;  %v261_v40 = vsel %vm258_vm1, %v260_v34, %v256_v37  ;;  %vm298_vm9 = vweird.f32 %v2271_v23  ;;  %vm273_vm11 = vcmp.eq.f32.partialorder %v272_v56, 8.507059e+37  ;;  %v2393_v34 = vpop.f32.mrf.mxu2 }
  0xa6   :  { %v2278_v27 = vpop.eup %1959  ;;  %v264_v35 = vmul.f32 %v2275_v24, %v2248_v4  ;;  %v2308_v45 = vmul.f32 %v261_v40, %v2209_v20  ;;  %vm269_vm5 = vweird.f32 %v2275_v24  ;;  %v304_v9 = vand.u32 2147483648, %v2271_v23 }
  0xa7   :  { %v1962_v31 = vpop.eup %1961  ;;  %3921 = vst [vmem:[#allocation6_spill] sm:$0xff] %v2284_v33  ;;  %v279_v36 = vmul.f32 %v2278_v27, %v2251_v7  ;;  %vm284_vm3 = vweird.f32 %v2278_v27  ;;  %vm2336_vm7 = vmor %vm268_vm4, %vm269_vm5  ;;  %v302_v11 = vand.u32 2147483647, %v2271_v23  ;;  %v1849_v40 = vmul.f32 -1.442695, %v2393_v34 }
  0xa8   :  { %578 = vrot.lane.b32.xlu1 %v2236_v63, %s2088_s1  ;;  %481 = vrot.lane.b32.xlu0 %v2236_v63, %s2089_s9  ;;  %v2297_v19 = vadd.f32 1.0, %v1962_v31  ;;  %v2299_v38 = vpop.eup %1963  ;;  %v265_v42 = vsub.f32 1.0, %v264_v35  ;;  %vm2332_vm6 = vmor %vm283_vm2, %vm284_vm3  ;;  %v305_v21 = vor.u32 1.1754944e-38, %v304_v9 }
  0xa9   :  { %762 = vrot.lane.b32.xlu2 %v2233_v60, %s2091_s11  ;;  %v280_v41 = vsub.f32 1.0, %v279_v36  ;;  %v294_v43 = vmul.f32 %v2299_v38, %v2271_v23  ;;  %vm299_vm10 = vweird.f32 %v2299_v38  ;;  %vm303_vm13 = vcmp.eq.f32.partialorder %v302_v11, 8.507059e+37 }
  0xaa   :  { %1965 = vrcp.f32 %v2297_v19  ;;  %v266_v48 = vmul.f32 %v2275_v24, %v265_v42  ;;  %vm2361_vm12 = vmor %vm298_vm9, %vm299_vm10  ;;  %vm313_vm14 = vweird.f32 %v2297_v19  ;;  %v317_v28 = vand.u32 2147483647, %v2297_v19  ;;  %v2410_v42 = vpop.permute.xlu2 %460 }
  0xab   :  { %v281_v46 = vmul.f32 %v2278_v27, %v280_v41  ;;  %v295_v49 = vsub.f32 1.0, %v294_v43  ;;  %1967 = vpow2.f32 %v1847_v44 }
  0xac   :  { %v267_v55 = vadd.f32 %v2275_v24, %v266_v48  ;;  %1969 = vpow2.f32 %v1848_v62  ;;  %vm318_vm1 = vcmp.eq.f32.partialorder %v317_v28, 8.507059e+37  ;;  %v2437_v62 = vpop.permute.xlu1 %436 }
  0xad   :  { %v282_v53 = vadd.f32 %v2278_v27, %v281_v46  ;;  %v296_v59 = vmul.f32 %v2299_v38, %v295_v49 }
  0xae   :  { %v271_v7 = vsel %vm2336_vm7, %v2275_v24, %v267_v55 }
  0xaf   :  { %v286_v4 = vsel %vm2332_vm6, %v2278_v27, %v282_v53  ;;  %v297_v10 = vadd.f32 %v2299_v38, %v296_v59  ;;  %v276_v18 = vsel %vm273_vm11, %v275_v0, %v271_v7  ;;  %v319_v27 = vand.u32 2147483648, %v2297_v19 }
  0xb0   :  { %665 = vrot.lane.b32.xlu1 %v2233_v60, %s2090_s10  ;;  %768 = vrot.lane.b32.xlu0 %v2236_v63, %s2091_s11  ;;  %v2320_v20 = vpop.eup %1965  ;;  %v291_v15 = vsel %vm288_vm8, %v290_v1, %v286_v4  ;;  %v2375_v25 = vmul.f32 %v276_v18, %v2215_v30  ;;  %v2443_v4 = vpop.permute.xlu0 %426 }
  0xb1   :  { %677 = vrot.lane.b32.xlu2 %v2284_v33, %s2090_s10  ;;  %v309_v61 = vmul.f32 %v2320_v20, %v2297_v19  ;;  %v1968_v2 = vpop.eup %1967  ;;  %v2368_v22 = vmul.f32 %v291_v15, %v2217_v32  ;;  %v301_v24 = vsel %vm2361_vm12, %v2299_v38, %v297_v10  ;;  %vm314_vm15 = vweird.f32 %v2320_v20 }
  0xb2   :  { %v2365_v17 = vadd.f32 1.0, %v1968_v2  ;;  %v1970_v26 = vpop.eup %1969  ;;  %v306_v32 = vsel %vm303_vm13, %v305_v21, %v301_v24  ;;  %vm315_vm0 = vmor %vm313_vm14, %vm314_vm15  ;;  %v320_v35 = vor.u32 1.1754944e-38, %v319_v27  ;;  %v2428_v56 = vpop.permute.xlu2 %545 }
  0xb3   :  { %v310_v14 = vsub.f32 1.0, %v309_v61  ;;  %v2391_v31 = vadd.f32 1.0, %v1970_v26  ;;  %v2396_v36 = vmul.f32 %v306_v32, %v2225_v47  ;;  %v2408_v47 = vpop.f32.mrf.mxu3  ;;  %v2092_v32 = vmov 3  }
  0xb4   :  { %1971 = vrcp.f32 %v2365_v17  ;;  %v1850_v48 = vmul.f32 -1.442695, %v2408_v47  ;;  %vm328_vm2 = vweird.f32 %v2365_v17  ;;  %v332_v54 = vand.u32 2147483647, %v2365_v17  ;;  %v2459_v18 = vpop.permute.xlu1 %452  ;;  %1909 = vset.pattern.permute.xlu1 %v2092_v32  ;;  %1908 = vset.pattern.permute.xlu0 %v2092_v32 }
  0xb5   :  { %v311_v23 = vmul.f32 %v2320_v20, %v310_v14  ;;  %3928 = vst [vmem:[#allocation7_spill] sm:$0xff] %v2396_v36  ;;  %1973 = vrcp.f32 %v2391_v31  ;;  %vm343_vm6 = vweird.f32 %v2391_v31  ;;  %v349_v1 = vand.u32 2147483648, %v2391_v31  ;;  %1910 = vset.pattern.permute.xlu2 %v2092_v32 }
  0xb6   :  { %1975 = vpow2.f32 %v1849_v40  ;;  %vm333_vm5 = vcmp.eq.f32.partialorder %v332_v54, 8.507059e+37  ;;  %v347_v9 = vand.u32 2147483647, %v2391_v31 }
  0xb7   :  { %v312_v30 = vadd.f32 %v2320_v20, %v311_v23  ;;  %1977 = vpow2.f32 %v1850_v48  ;;  %v350_v14 = vor.u32 1.1754944e-38, %v349_v1 }
  0xb8   :  { %584 = vrot.lane.b32.xlu1 %v2284_v33, %s2088_s1  ;;  %487 = vrot.lane.b32.xlu0 %v2284_v33, %s2089_s9  ;;  %vm348_vm9 = vcmp.eq.f32.partialorder %v347_v9, 8.507059e+37  ;;  %v2461_v21 = vpop.permute.xlu0 %431 }
  0xb9   :  { %683 = vrot.lane.b32.xlu2 %v2308_v45, %s2090_s10  ;;  %v316_v38 = vsel %vm315_vm0, %v2320_v20, %v312_v30 }
  0xba   :  { %v1972_v37 = vpop.eup %1971  ;;  %v321_v41 = vsel %vm318_vm1, %v320_v35, %v316_v38  ;;  %v2450_v15 = vpop.permute.xlu2 %634 }
  0xbb   :  { %v324_v19 = vmul.f32 %v1972_v37, %v2365_v17  ;;  %v2413_v43 = vmul.f32 %v321_v41, %v2246_v3  ;;  %v1974_v46 = vpop.eup %1973  ;;  %vm329_vm3 = vweird.f32 %v1972_v37  ;;  %v334_v3 = vand.u32 2147483648, %v2365_v17 }
  0xbc   :  { %v1976_v49 = vpop.eup %1975  ;;  %v339_v50 = vmul.f32 %v1974_v46, %v2391_v31  ;;  %vm330_vm4 = vmor %vm328_vm2, %vm329_vm3  ;;  %vm344_vm7 = vweird.f32 %v1974_v46  ;;  %v395_v31 = vlaneseq  ;;  %v2478_v40 = vpop.permute.xlu1 %541 }
  0xbd   :  { %v325_v44 = vsub.f32 1.0, %v324_v19  ;;  %v2425_v51 = vadd.f32 1.0, %v1976_v49  ;;  %v335_v57 = vor.u32 1.1754944e-38, %v334_v3  ;;  %v1978_v58 = vpop.eup %1977  ;;  %vm345_vm8 = vmor %vm343_vm6, %vm344_vm7 }
  0xbe   :  { %v340_v55 = vsub.f32 1.0, %v339_v50  ;;  %v2441_v2 = vadd.f32 1.0, %v1978_v58 }
  0xbf   :  { %v326_v20 = vmul.f32 %v1972_v37, %v325_v44  ;;  %1979 = vrcp.f32 %v2425_v51  ;;  %vm358_vm10 = vweird.f32 %v2425_v51  ;;  %v362_v35 = vand.u32 2147483647, %v2425_v51 }
  0xc0   :  { %590 = vrot.lane.b32.xlu1 %v2308_v45, %s2088_s1  ;;  %493 = vrot.lane.b32.xlu0 %v2308_v45, %s2089_s9  ;;  %v341_v61 = vmul.f32 %v1974_v46, %v340_v55  ;;  %1981 = vrcp.f32 %v2441_v2  ;;  %v2480_v19 = vpop.permute.xlu0 %537  ;;  %v2482_v44 = vand.u32 127, %v395_v31  ;;  %vm373_vm14 = vweird.f32 %v2441_v2 }
  0xc1   :  { %774 = vrot.lane.b32.xlu2 %v2284_v33, %s2091_s11  ;;  %v327_v53 = vadd.f32 %v1972_v37, %v326_v20  ;;  %vm363_vm13 = vcmp.eq.f32.partialorder %v362_v35, 8.507059e+37  ;;  %v379_v20 = vand.u32 2147483648, %v2441_v2 }
  0xc2   :  { %v342_v7 = vadd.f32 %v1974_v46, %v341_v61  ;;  %v2473_v28 = vpop.permute.xlu2 %727  ;;  %v398_v3 = vadd.s32 256, %v2482_v44  ;;  %vm596_vm7 = vcmp.lt.s32.totalorder %v2482_v44, 16 }
  0xc3   :  { %v331_v59 = vsel %vm330_vm4, %v1972_v37, %v327_v53  ;;  %v377_v53 = vand.u32 2147483647, %v2441_v2  ;;  %v380_v58 = vor.u32 1.1754944e-38, %v379_v20  ;;  %vm689_vm4 = vcmp.lt.s32.totalorder %v2482_v44, 15 }
  0xc4   :  { %v336_v0 = vsel %vm333_vm5, %v335_v57, %v331_v59  ;;  %v346_v16 = vsel %vm345_vm8, %v1974_v46, %v342_v7  ;;  %v2499_v55 = vpop.permute.xlu1 %630  ;;  %v402_v59 = vand.u32 255, %v398_v3  ;;  %v2517_v7 = vadd.s32 384, %v2482_v44 }
  0xc5   :  { %v1980_v10 = vpop.eup %1979  ;;  %v2447_v11 = vmul.f32 %v336_v0, %v2301_v39  ;;  %v351_v39 = vsel %vm348_vm9, %v350_v14, %v346_v16  ;;  %vm378_vm1 = vcmp.eq.f32.partialorder %v377_v53, 8.507059e+37  ;;  %vm499_vm8 = vcmp.lt.s32.totalorder %v2482_v44, 17 }
  0xc6   :  { %v354_v17 = vmul.f32 %v1980_v10, %v2425_v51  ;;  %v1982_v23 = vpop.eup %1981  ;;  %v2464_v26 = vmul.f32 %v351_v39, %v2326_v52  ;;  %vm359_vm11 = vweird.f32 %v1980_v10  ;;  %v364_v52 = vand.u32 2147483648, %v2425_v51  ;;  %3930 = vst [vmem:[#allocation9_spill] sm:$0xff] %v2517_v7 }
  0xc7   :  { %v369_v30 = vmul.f32 %v1982_v23, %v2441_v2  ;;  %vm360_vm12 = vmor %vm358_vm10, %vm359_vm11  ;;  %vm374_vm15 = vweird.f32 %v1982_v23  ;;  %v2511_v1 = vand.u32 15, %v402_v59  ;;  %vm2519_vm2 = vcmp.ge.s32.totalorder %v402_v59, 16 }
  0xc8   :  { %780 = vrot.lane.b32.xlu1 %v2308_v45, %s2091_s11  ;;  %673 = vrot.lane.b32.xlu0 %v2368_v22, %s2090_s10  ;;  %v355_v24 = vsub.f32 1.0, %v354_v17  ;;  %v365_v41 = vor.u32 1.1754944e-38, %v364_v52  ;;  %vm375_vm0 = vmor %vm373_vm14, %vm374_vm15  ;;  %v2501_v57 = vpop.permute.xlu0 %638  ;;  %v3899_v16 = vand.u32 255, %v2517_v7 }
  0xc9   :  { %574 = vrot.lane.b32.xlu2 %v2375_v25, %s2088_s1  ;;  %v370_v38 = vsub.f32 1.0, %v369_v30  ;;  %3929 = vst [vmem:[#allocation8_spill] sm:$0xff] %v2511_v1  ;;  %vm3900_vm3 = vcmp.le.s32.totalorder %v2511_v1, 14  ;;  %vm418_vm15 = vcmp.ge.s32.totalorder %v2511_v1, 1 }
  0xca   :  { %v356_v27 = vmul.f32 %v1980_v10, %v355_v24  ;;  %vm2539_vm5 = vmand %vm2519_vm2, %vm3900_vm3 }
  0xcb   :  { %v371_v48 = vmul.f32 %v1982_v23, %v370_v38 }
  0xcc   :  { %v357_v37 = vadd.f32 %v1980_v10, %v356_v27  ;;  %v2557_v27 = vand.u32 15, %v3899_v16 }
  0xcd   :  { %v372_v51 = vadd.f32 %v1982_v23, %v371_v48 }
  0xce   :  { %v361_v46 = vsel %vm360_vm12, %v1980_v10, %v357_v37  ;;  %v2528_v10 = vpop.permute.xlu1 %735  ;;  %vm423_vm6 = vcmp.le.s32.totalorder %v2557_v27, 14  ;;  %vm786_vm12 = vcmp.lt.s32.totalorder %v2482_v44, 1  ;;  %vm419_vm3 = vcmp.ge.s32.totalorder %v2557_v27, 1 }
  0xcf   :  { %v366_v49 = vsel %vm363_vm13, %v365_v41, %v361_v46  ;;  %v376_v61 = vsel %vm375_vm0, %v1982_v23, %v372_v51  ;;  %v2550_v23 = vadd.s32 128, %v2482_v44  ;;  %v400_v41 = vand.u32 255, %v2482_v44  ;;  %vm2668_vm0 = vmand %vm2519_vm2, %vm418_vm15 }
  0xd0   :  { %679 = vrot.lane.b32.xlu0 %v2396_v36, %s2090_s10  ;;  %477 = vrot.lane.b32.xlu1 %v2375_v25, %s2089_s9  ;;  %v2497_v54 = vmul.f32 %v366_v49, %v2393_v34  ;;  %v381_v0 = vsel %vm378_vm1, %v380_v58, %v376_v61  ;;  %v2530_v14 = vpop.permute.xlu0 %731  ;;  %v440_v46 = vmul.f32 %v2443_v4, %v2236_v63 }
  0xd1   :  { %580 = vrot.lane.b32.xlu2 %v2368_v22, %s2088_s1  ;;  %v2514_v2 = vmul.f32 %v381_v0, %v2408_v47  ;;  %v3933_v47 = vmov 0  ;;  %3936 = vst [vmem:[#allocation11_spill] sm:$0xff] %v2550_v23  ;;  %v3902_v30 = vand.u32 255, %v2550_v23  ;;  %v2592_v20 = vand.u32 15, %v400_v41 }
  0xd2   :  { %v3934_v47 = vsel %vm2539_vm5, 4294967295, %v3933_v47  ;;  %v464_v59 = vadd.f32 %v2459_v18, %v440_v46  ;;  %vm2606_vm10 = vcmp.ge.s32.totalorder %v400_v41, 16 }
  0xd3   :  { %3935 = vst [vmem:[#allocation10_spill] sm:$0xff] %v3934_v47  ;;  %vm3901_vm11 = vcmp.le.s32.totalorder %v2592_v20, 14  ;;  %vm416_vm1 = vcmp.ge.s32.totalorder %v2592_v20, 1 }
  0xd4   :  { %3937 = vst [vmem:[#allocation12_spill] sm:$0xff] %v2592_v20  ;;  %vm2624_vm14 = vmand %vm2606_vm10, %vm3901_vm11 }
  0xd5   :  { %vm2704_vm11 = vmand %vm2606_vm10, %vm416_vm1 }
  0xd8   :  { %685 = vrot.lane.b32.xlu0 %v2413_v43, %s2090_s10  ;;  %483 = vrot.lane.b32.xlu1 %v2368_v22, %s2089_s9 }
  0xd9   :  { %667 = vrot.lane.b32.xlu2 %v2375_v25, %s2090_s10 }
  0xe0   :  { %776 = vrot.lane.b32.xlu0 %v2396_v36, %s2091_s11  ;;  %764 = vrot.lane.b32.xlu1 %v2375_v25, %s2091_s11 }
  0xe1   :  { %586 = vrot.lane.b32.xlu2 %v2396_v36, %s2088_s1 }
  0xe8   :  { %770 = vrot.lane.b32.xlu1 %v2368_v22, %s2091_s11  ;;  %576 = vrot.lane.b32.xlu0 %v2447_v11, %s2088_s1 }
  0xe9   :  { %592 = vrot.lane.b32.xlu2 %v2413_v43, %s2088_s1 }
  0xf0   :  { %489 = vrot.lane.b32.xlu1 %v2396_v36, %s2089_s9  ;;  %582 = vrot.lane.b32.xlu0 %v2464_v26, %s2088_s1 }
  0xf1   :  { %782 = vrot.lane.b32.xlu2 %v2413_v43, %s2091_s11 }
  0xf8   :  { %495 = vrot.lane.b32.xlu1 %v2413_v43, %s2089_s9  ;;  %772 = vrot.lane.b32.xlu0 %v2464_v26, %s2091_s11 }
  0xf9   :  { %479 = vrot.lane.b32.xlu2 %v2447_v11, %s2089_s9 }
  0xfb   :  { %v2492_v50 = vpop.permute.xlu2 %671 }
 0x100   :  { %669 = vrot.lane.b32.xlu1 %v2447_v11, %s2090_s10  ;;  %588 = vrot.lane.b32.xlu0 %v2497_v54, %s2088_s1 }
 0x101   :  { %485 = vrot.lane.b32.xlu2 %v2464_v26, %s2089_s9 }
 0x103   :  { %v2509_v34 = vpop.permute.xlu2 %762 }
 0x108   :  { %675 = vrot.lane.b32.xlu1 %v2464_v26, %s2090_s10  ;;  %594 = vrot.lane.b32.xlu0 %v2514_v2, %s2088_s1 }
 0x109   :  { %766 = vrot.lane.b32.xlu2 %v2447_v11, %s2091_s11 }
 0x10b   :  { %v678_v17 = vpop.permute.xlu2 %677 }
 0x10c   :  { %v693_v39 = vsel %vm689_vm4, %v2492_v50, %v678_v17 }
 0x10d   :  { %v716_v24 = vsel %vm2539_vm5, %v693_v39, 0.0 }
 0x10e   :  { %v2553_v32 = vmul.f32 %v2473_v28, %v716_v24  ;;  %v3940_v24 = vmov 0 }
 0x10f   :  { %v3941_v24 = vsel %vm2624_vm14, 4294967295, %v3940_v24 }
 0x110   :  { %824 = vperm.xlu1 %1909, %v2166_v8   ;;  %820 = vperm.xlu0 %1908, %v2157_v6   ;;  %v2575_v6 = vand.u32 15, %v3902_v30  ;;  %3942 = vst [vmem:[#allocation13_spill] sm:$0xff] %v3941_v24 }
 0x111   :  { %491 = vrot.lane.b32.xlu2 %v2497_v54, %s2089_s9 }
 0x112   :  { %v2565_v52 = vpop.permute.xlu1 %572  ;;  %v2567_v31 = vpop.permute.xlu0 %475  ;;  %vm417_vm9 = vcmp.ge.s32.totalorder %v2575_v6, 1  ;;  %vm421_vm13 = vcmp.le.s32.totalorder %v2575_v6, 14 }
 0x113   :  { %v684_v37 = vpop.permute.xlu2 %683 }
 0x114   :  { %v690_v35 = vsel %vm689_vm4, %v678_v17, %v684_v37 }
 0x115   :  { %v717_v8 = vsel %vm423_vm6, %v690_v35, 0.0 }
 0x116   :  { %v2578_v38 = vmul.f32 %v2473_v28, %v717_v8 }
 0x118   :  { %681 = vrot.lane.b32.xlu1 %v2497_v54, %s2090_s10  ;;  %863 = vrot.lane.b32.xlu0 %v2368_v22, %s2093_s12 }
 0x119   :  { %497 = vrot.lane.b32.xlu2 %v2514_v2, %s2089_s9  ;;  %s1814_s9 = sshll.u32 %s3894_s4, 4  ;;  %s1815_s9 = int_to_ptr.hbm [resolvable:$true] %s1814_s9 }
 0x11a   :  { %v579_v48 = vpop.permute.xlu1 %578  ;;  %v482_v49 = vpop.permute.xlu0 %481 }
 0x11b   :  { %v2594_v3 = vpop.permute.xlu2 %774  ;;  %v603_v51 = vsel %vm596_vm7, %v2565_v52, %v579_v48  ;;  %v506_v53 = vsel %vm499_vm8, %v2567_v31, %v482_v49 }
 0x11c   :  { %v525_v58 = vsel %vm417_vm9, %v506_v53, 0.0  ;;  %v642_v17 = vmul.f32 %v2499_v55, %v603_v51 }
 0x11d   :  { %v549_v61 = vmul.f32 %v2480_v19, %v525_v58 }
 0x11f   :  { %v561_v39 = vadd.f32 %v549_v61, %v464_v59 }
 0x120   :  { %687 = vrot.lane.b32.xlu1 %v2514_v2, %s2090_s10  ;;  %873 = vrot.lane.b32.xlu0 %v2308_v45, %s2093_s12 }
 0x121   :  { %855 = vrot.lane.b32.xlu2 %v2233_v60, %s2093_s12  ;;  %v654_v35 = vadd.f32 %v642_v17, %v561_v39 }
 0x122   :  { %v666_v8 = vpop.permute.xlu1 %665  ;;  %v769_v41 = vpop.permute.xlu0 %768 }
 0x123   :  { %v696_v46 = vsel %vm689_vm4, %v666_v8, %v2492_v50  ;;  %v699_v51 = vsel %vm689_vm4, %v684_v37, %v666_v8  ;;  %v2636_v53 = vsel %vm786_vm12, %v769_v41, %v2594_v3  ;;  %v2641_v58 = vsel %vm786_vm12, %v2509_v34, %v769_v41  ;;  %v2643_v59 = vpop.permute.xlu2 %574 }
 0x124   :  { %v714_v61 = vsel %vm2624_vm14, %v699_v51, 0.0  ;;  %v715_v50 = vsel %vm421_vm13, %v696_v46, 0.0  ;;  %v441_v8 = vmul.f32 %v2443_v4, %v2284_v33  ;;  %v808_v0 = vsel %vm417_vm9, %v2641_v58, 0.0 }
 0x125   :  { %v2650_v37 = vmul.f32 %v2473_v28, %v714_v61  ;;  %v739_v17 = vmul.f32 %v2473_v28, %v715_v50 }
 0x126   :  { %v465_v12 = vadd.f32 %v2459_v18, %v441_v8 }
 0x127   :  { %v2653_v39 = vadd.f32 %v739_v17, %v654_v35 }
 0x128   :  { %778 = vrot.lane.b32.xlu1 %v2497_v54, %s2091_s11  ;;  %859 = vrot.lane.b32.xlu0 %v2447_v11, %s2093_s12 }
 0x129   :  { %3943 = vst [vmem:[#allocation14_spill] sm:$0xff] %v2653_v39  ;;  %784 = vrot.lane.b32.xlu2 %v2514_v2, %s2091_s11 }
 0x12a   :  { %v585_v35 = vpop.permute.xlu1 %584  ;;  %v488_v41 = vpop.permute.xlu0 %487 }
 0x12b   :  { %v600_v46 = vsel %vm596_vm7, %v579_v48, %v585_v35  ;;  %v503_v51 = vsel %vm499_vm8, %v482_v49, %v488_v41  ;;  %v581_v61 = vpop.permute.xlu2 %580 }
 0x12c   :  { %v619_v50 = vsel %vm2519_vm2, %v600_v46, 0.0  ;;  %v526_v17 = vsel %vm2668_vm0, %v503_v51, 0.0  ;;  %v2683_v13 = vsel %vm596_vm7, %v2643_v59, %v581_v61  ;;  %v442_v46 = vmul.f32 %v2443_v4, %v2308_v45 }
 0x12d   :  { %v550_v16 = vmul.f32 %v2480_v19, %v526_v17  ;;  %v643_v48 = vmul.f32 %v2499_v55, %v619_v50  ;;  %v439_v51 = vmul.f32 %v2443_v4, %v2233_v60  ;;  %v2094_v17 = vmov 5  }
 0x12e   :  { %1911 = vset.pattern.permute.xlu1 %v2094_v17  ;;  %v466_v39 = vadd.f32 %v2459_v18, %v442_v46 }
 0x12f   :  { %v562_v49 = vadd.f32 %v550_v16, %v465_v12 }
 0x130   :  { %857 = vrot.lane.b32.xlu1 %v2375_v25, %s2093_s12  ;;  %877 = vrot.lane.b32.xlu0 %v2514_v2, %s2093_s12 }
 0x131   :  { %v655_v8 = vadd.f32 %v643_v48, %v562_v49  ;;  %861 = vrot.lane.b32.xlu2 %v2236_v63, %s2093_s12 }
 0x132   :  { %v591_v16 = vpop.permute.xlu1 %590  ;;  %v494_v50 = vpop.permute.xlu0 %493 }
 0x133   :  { %v597_v4 = vsel %vm596_vm7, %v585_v35, %v591_v16  ;;  %v606_v48 = vsel %vm596_vm7, %v591_v16, %v2565_v52  ;;  %v500_v49 = vsel %vm499_vm8, %v488_v41, %v494_v50  ;;  %v509_v30 = vsel %vm499_vm8, %v494_v50, %v2567_v31  ;;  %v668_v7 = vpop.permute.xlu2 %667 }
 0x134   :  { %v617_v23 = vsel %vm2606_vm10, %v606_v48, 0.0  ;;  %v524_v35 = vsel %vm2704_vm11, %v509_v30, 0.0  ;;  %v527_v20 = vsel %vm419_vm3, %v500_v49, 0.0  ;;  %v463_v52 = vadd.f32 %v2459_v18, %v439_v51 }
 0x135   :  { %v548_v41 = vmul.f32 %v2480_v19, %v524_v35  ;;  %v551_v16 = vmul.f32 %v2480_v19, %v527_v20  ;;  %v2729_v31 = vadd.f32 %v2553_v32, %v655_v8  ;;  %v641_v50 = vmul.f32 %v2499_v55, %v617_v23 }
 0x136   :  { %v644_v48 = vmul.f32 %v2499_v55, %v597_v4 }
 0x137   :  { %3948 = vst [vmem:[#allocation15_spill] sm:$0xff] %v2729_v31  ;;  %v560_v46 = vadd.f32 %v548_v41, %v463_v52  ;;  %v563_v1 = vadd.f32 %v551_v16, %v466_v39  ;;  %v444_v41 = vmul.f32 %v2461_v21, %v2368_v22 }
 0x138   :  { %867 = vrot.lane.b32.xlu1 %v2284_v33, %s2093_s12  ;;  %948 = vrot.lane.b32.xlu0 %v2233_v60, %s2095_s13 }
 0x139   :  { %v653_v18 = vadd.f32 %v641_v50, %v560_v46  ;;  %v656_v30 = vadd.f32 %v644_v48, %v563_v1  ;;  %869 = vrot.lane.b32.xlu2 %v2396_v36, %s2093_s12 }
 0x13a   :  { %v781_v19 = vpop.permute.xlu1 %780  ;;  %v674_v32 = vpop.permute.xlu0 %673 }
 0x13b   :  { %v2742_v55 = vsel %vm786_vm12, %v2594_v3, %v781_v19  ;;  %v2747_v23 = vsel %vm786_vm12, %v781_v19, %v2509_v34  ;;  %v697_v20 = vsel %vm689_vm4, %v668_v7, %v674_v32  ;;  %v587_v39 = vpop.permute.xlu2 %586  ;;  %v2752_v1 = vadd.f32 %v2650_v37, %v653_v18 }
 0x13c   :  { %v719_v51 = vsel %vm421_vm13, %v697_v20, 0.0  ;;  %v2758_v8 = vsel %vm596_vm7, %v581_v61, %v587_v39  ;;  %v2762_v4 = vadd.f32 %v2578_v38, %v656_v30 }
 0x13d   :  { %v743_v3 = vmul.f32 %v2530_v14, %v719_v51  ;;  %v646_v51 = vmul.f32 %v2450_v15, %v2683_v13  ;;  %v623_v24 = vsel %vm2519_vm2, %v2758_v8, 0.0  ;;  %v443_v8 = vmul.f32 %v2461_v21, %v2375_v25 }
 0x13e   :  { %3949 = vst [vmem:[#allocation16_spill] sm:$0xff] %v2762_v4  ;;  %v647_v4 = vmul.f32 %v2450_v15, %v623_v24 }
 0x140   :  { %875 = vrot.lane.b32.xlu1 %v2413_v43, %s2093_s12  ;;  %956 = vrot.lane.b32.xlu0 %v2368_v22, %s2095_s13 }
 0x141   :  { %828 = vperm.xlu2 %1910, %v2152_v5  }
 0x142   :  { %v680_v34 = vpop.permute.xlu0 %679  ;;  %v2769_v37 = vpop.permute.xlu1 %477 }
 0x143   :  { %v694_v61 = vsel %vm689_vm4, %v674_v32, %v680_v34  ;;  %v593_v49 = vpop.permute.xlu2 %592 }
 0x144   :  { %v720_v35 = vsel %vm2539_vm5, %v694_v61, 0.0  ;;  %v2777_v38 = vsel %vm596_vm7, %v587_v39, %v593_v49  ;;  %v2782_v52 = vsel %vm596_vm7, %v593_v49, %v2643_v59  ;;  %v2821_v61 = vld [vmem:[%s3893_s3] sm:$0xff]  ;;  %v2829_v49 = vld [vmem:[%s3893_s3 + $0x8] sm:$0xff] }
 0x145   :  { %v2785_v5 = vmul.f32 %v2530_v14, %v720_v35 }
 0x148   :  { %865 = vrot.lane.b32.xlu1 %v2464_v26, %s2093_s12  ;;  %966 = vrot.lane.b32.xlu0 %v2308_v45, %s2095_s13 }
 0x149   :  { %871 = vrot.lane.b32.xlu2 %v2497_v54, %s2093_s12 }
 0x14a   :  { %v686_v16 = vpop.permute.xlu0 %685  ;;  %v484_v50 = vpop.permute.xlu1 %483  ;;  %1912 = vset.pattern.permute.xlu2 %v2094_v17 }
 0x14b   :  { %v691_v59 = vsel %vm689_vm4, %v680_v34, %v686_v16  ;;  %v700_v48 = vsel %vm689_vm4, %v686_v16, %v668_v7  ;;  %v783_v46 = vpop.permute.xlu2 %782  ;;  %v507_v18 = vsel %vm499_vm8, %v2769_v37, %v484_v50  ;;  %v468_v7 = vadd.f32 %v2389_v29, %v444_v41 }
 0x14c   :  { %v718_v30 = vsel %vm2624_vm14, %v700_v48, 0.0  ;;  %v721_v19 = vsel %vm423_vm6, %v691_v59, 0.0  ;;  %v529_v17 = vsel %vm417_vm9, %v507_v18, 0.0  ;;  %v3909_v18 = vmov 6  }
 0x14d   :  { %v2809_v32 = vmul.f32 %v2530_v14, %v718_v30  ;;  %v2812_v20 = vmul.f32 %v2530_v14, %v721_v19  ;;  %v553_v39 = vmul.f32 %v2478_v40, %v529_v17 }
 0x14f   :  { %v565_v34 = vadd.f32 %v553_v39, %v468_v7 }
 0x150   :  { %913 = vperm.xlu1 %1911, %v2821_v61   ;;  %952 = vrot.lane.b32.xlu0 %v2447_v11, %s2095_s13 }
 0x151   :  { %v658_v14 = vadd.f32 %v646_v51, %v565_v34  ;;  %917 = vperm.xlu2 %1912, %v2829_v49   ;;  %v448_v51 = vmul.f32 %v2437_v62, %v2464_v26 }
 0x152   :  { %v777_v13 = vpop.permute.xlu0 %776  ;;  %v765_v35 = vpop.permute.xlu1 %764 }
 0x153   :  { %v2834_v41 = vsel %vm786_vm12, %v777_v13, %v783_v46  ;;  %v2838_v16 = vsel %vm786_vm12, %v783_v46, %v765_v35  ;;  %v2840_v59 = vpop.permute.xlu2 %479  ;;  %v2842_v48 = vadd.f32 %v743_v3, %v658_v14  ;;  %v445_v14 = vmul.f32 %v2461_v21, %v2396_v36 }
 0x154   :  { %v814_v58 = vsel %vm419_vm3, %v2834_v41, 0.0 }
 0x158   :  { %950 = vrot.lane.b32.xlu1 %v2375_v25, %s2095_s13  ;;  %970 = vrot.lane.b32.xlu0 %v2514_v2, %s2095_s13 }
 0x159   :  { %954 = vrot.lane.b32.xlu2 %v2236_v63, %s2095_s13  ;;  %1913 = vset.pattern.permute.xlu1 %v3909_v18 }
 0x15a   :  { %v771_v30 = vpop.permute.xlu1 %770  ;;  %v2851_v19 = vpop.permute.xlu0 %576 }
 0x15b   :  { %v2855_v46 = vsel %vm786_vm12, %v771_v30, %v777_v13  ;;  %v2859_v3 = vsel %vm786_vm12, %v765_v35, %v771_v30  ;;  %v486_v17 = vpop.permute.xlu2 %485  ;;  %v472_v13 = vadd.f32 %v2410_v42, %v448_v51 }
 0x15c   :  { %v508_v7 = vsel %vm499_vm8, %v2840_v59, %v486_v17 }
 0x15d   :  { %v533_v39 = vsel %vm417_vm9, %v508_v7, 0.0 }
 0x15e   :  { %v557_v34 = vmul.f32 %v2428_v56, %v533_v39 }
 0x160   :  { %960 = vrot.lane.b32.xlu1 %v2284_v33, %s2095_s13  ;;  %1045 = vrot.lane.b32.xlu0 %v2233_v60, %s2097_s18  ;;  %v569_v47 = vadd.f32 %v557_v34, %v472_v13  ;;  %v469_v60 = vadd.f32 %v2389_v29, %v445_v14  ;;  %v2905_v14 = vld [vmem:[%s3893_s3 + $0x10] sm:$0xff] }
 0x161   :  { %962 = vrot.lane.b32.xlu2 %v2396_v36, %s2095_s13 }
 0x162   :  { %v490_v35 = vpop.permute.xlu1 %489  ;;  %v583_v30 = vpop.permute.xlu0 %582 }
 0x163   :  { %v504_v7 = vsel %vm499_vm8, %v484_v50, %v490_v35  ;;  %v605_v39 = vsel %vm596_vm7, %v2851_v19, %v583_v30  ;;  %v2883_v18 = vpop.permute.xlu2 %766 }
 0x164   :  { %v530_v36 = vsel %vm2668_vm0, %v504_v7, 0.0  ;;  %v650_v51 = vmul.f32 %v2501_v57, %v605_v39 }
 0x165   :  { %v554_v50 = vmul.f32 %v2478_v40, %v530_v36 }
 0x166   :  { %v2893_v33 = vadd.f32 %v650_v51, %v569_v47 }
 0x167   :  { %v566_v31 = vadd.f32 %v554_v50, %v469_v60  ;;  %v446_v60 = vmul.f32 %v2461_v21, %v2413_v43  ;;  %v621_v21 = vsel %vm2606_vm10, %v2782_v52, 0.0  ;;  %v467_v50 = vadd.f32 %v2389_v29, %v443_v8 }
 0x168   :  { %968 = vrot.lane.b32.xlu1 %v2413_v43, %s2095_s13  ;;  %1053 = vrot.lane.b32.xlu0 %v2368_v22, %s2097_s18  ;;  %v449_v52 = vmul.f32 %v2437_v62, %v2497_v54 }
 0x169   :  { %v659_v34 = vadd.f32 %v647_v4, %v566_v31  ;;  %921 = vperm.xlu2 %1912, %v2905_v14   ;;  %v470_v51 = vadd.f32 %v2389_v29, %v446_v60 }
 0x16a   :  { %v496_v36 = vpop.permute.xlu1 %495  ;;  %v2910_v47 = vpop.permute.xlu0 %772 }
 0x16b   :  { %3950 = vst [vmem:[#allocation17_spill] sm:$0xff] %v2910_v47  ;;  %v501_v24 = vsel %vm499_vm8, %v490_v35, %v496_v36  ;;  %v510_v31 = vsel %vm499_vm8, %v496_v36, %v2769_v37  ;;  %v2921_v4 = vsel %vm786_vm12, %v2883_v18, %v2910_v47  ;;  %v492_v13 = vpop.permute.xlu2 %491  ;;  %v2924_v7 = vadd.f32 %v2785_v5, %v659_v34 }
 0x16c   :  { %v528_v35 = vsel %vm2704_vm11, %v510_v31, 0.0  ;;  %v531_v37 = vsel %vm419_vm3, %v501_v24, 0.0  ;;  %v505_v39 = vsel %vm499_vm8, %v486_v17, %v492_v13  ;;  %v645_v31 = vmul.f32 %v2450_v15, %v621_v21 }
 0x16d   :  { %v552_v5 = vmul.f32 %v2478_v40, %v528_v35  ;;  %v555_v34 = vmul.f32 %v2478_v40, %v531_v37  ;;  %v534_v36 = vsel %vm2668_vm0, %v505_v39, 0.0  ;;  %v648_v24 = vmul.f32 %v2450_v15, %v2777_v38 }
 0x16e   :  { %v558_v8 = vmul.f32 %v2428_v56, %v534_v36  ;;  %v3951_v21 = vmov 6   ;;  %v473_v15 = vadd.f32 %v2410_v42, %v449_v52 }
 0x16f   :  { %v564_v17 = vadd.f32 %v552_v5, %v467_v50  ;;  %v567_v47 = vadd.f32 %v555_v34, %v470_v51 }
 0x170   :  { %958 = vrot.lane.b32.xlu1 %v2464_v26, %s2095_s13  ;;  %1063 = vrot.lane.b32.xlu0 %v2308_v45, %s2097_s18  ;;  %v570_v5 = vadd.f32 %v558_v8, %v473_v15 }
 0x171   :  { %v657_v29 = vadd.f32 %v645_v31, %v564_v17  ;;  %v660_v40 = vadd.f32 %v648_v24, %v567_v47  ;;  %964 = vrot.lane.b32.xlu2 %v2497_v54, %s2095_s13 }
 0x172   :  { %v2953_v28 = vpop.permute.xlu1 %669  ;;  %v589_v60 = vpop.permute.xlu0 %588  ;;  %1914 = vset.pattern.permute.xlu2 %v3951_v21 }
 0x173   :  { %v602_v38 = vsel %vm596_vm7, %v583_v30, %v589_v60  ;;  %v498_v35 = vpop.permute.xlu2 %497  ;;  %v754_v37 = vadd.f32 %v2809_v32, %v657_v29  ;;  %v2961_v47 = vadd.f32 %v2812_v20, %v660_v40  ;;  %v450_v32 = vmul.f32 %v2437_v62, %v2514_v2 }
 0x174   :  { %v627_v39 = vsel %vm2519_vm2, %v602_v38, 0.0  ;;  %v502_v51 = vsel %vm499_vm8, %v492_v13, %v498_v35  ;;  %v511_v50 = vsel %vm499_vm8, %v498_v35, %v2840_v59  ;;  %v447_v13 = vmul.f32 %v2437_v62, %v2447_v11 }
 0x175   :  { %v651_v34 = vmul.f32 %v2501_v57, %v627_v39  ;;  %v535_v30 = vsel %vm419_vm3, %v502_v51, 0.0  ;;  %v532_v9 = vsel %vm2704_vm11, %v511_v50, 0.0  ;;  %v474_v36 = vadd.f32 %v2410_v42, %v450_v32  ;;  %v3952_v51 = vld [vmem:[#allocation8_spill] sm:$0xff] }
 0x176   :  { %v559_v52 = vmul.f32 %v2428_v56, %v535_v30  ;;  %v556_v59 = vmul.f32 %v2428_v56, %v532_v9  ;;  %v471_v24 = vadd.f32 %v2410_v42, %v447_v13  ;;  %v3953_v50 = vld [vmem:[#allocation12_spill] sm:$0xff]  ;;  %vm879_vm2 = vcmp.lt.s32.totalorder %v2482_v44, 127 }
 0x177   :  { %v2977_v20 = vadd.f32 %v651_v34, %v570_v5  ;;  %v810_v5 = vsel %vm419_vm3, %v2742_v55, 0.0  ;;  %v2098_v34 = vmov 7   ;;  %v813_v55 = vsel %vm418_vm15, %v2855_v46, 0.0 }
 0x178   :  { %1010 = vperm.xlu1 %1913, %v2821_v61   ;;  %1049 = vrot.lane.b32.xlu0 %v2447_v11, %s2097_s18  ;;  %v571_v40 = vadd.f32 %v559_v52, %v474_v36  ;;  %v568_v15 = vadd.f32 %v556_v59, %v471_v24 }
 0x179   :  { %1014 = vperm.xlu2 %1914, %v2829_v49  }
 0x17a   :  { %v676_v12 = vpop.permute.xlu1 %675  ;;  %v595_v31 = vpop.permute.xlu0 %594 }
 0x17b   :  { %v698_v62 = vsel %vm689_vm4, %v2953_v28, %v676_v12  ;;  %v599_v17 = vsel %vm596_vm7, %v589_v60, %v595_v31  ;;  %v608_v29 = vsel %vm596_vm7, %v595_v31, %v2851_v19  ;;  %v2997_v56 = vpop.permute.xlu2 %855  ;;  %vm3964_vm7 = vcmp.le.s32.totalorder %v3952_v51, 14 }
 0x17c   :  { %v723_v8 = vsel %vm421_vm13, %v698_v62, 0.0  ;;  %v625_v42 = vsel %vm2606_vm10, %v608_v29, 0.0  ;;  %v652_v21 = vmul.f32 %v2501_v57, %v599_v17  ;;  %vm3966_vm10 = vmmov %vm3964_vm7 }
 0x17d   :  { %v747_v38 = vmul.f32 %v2528_v10, %v723_v8  ;;  %v649_v60 = vmul.f32 %v2501_v57, %v625_v42  ;;  %v809_v57 = vsel %vm418_vm15, %v2636_v53, 0.0  ;;  %v811_v53 = vsel %vm416_vm1, %v2838_v16, 0.0  ;;  %v3955_v42 = vld [vmem:[#allocation15_spill] sm:$0xff]  ;;  %vm3967_vm11 = vmmov %vm3964_vm7 }
 0x17e   :  { %v3006_v35 = vadd.f32 %v652_v21, %v571_v40  ;;  %v3954_v40 = vld [vmem:[#allocation14_spill] sm:$0xff] }
 0x17f   :  { %v3009_v19 = vadd.f32 %v747_v38, %v2893_v33  ;;  %v3011_v39 = vadd.f32 %v649_v60, %v568_v15  ;;  %v807_v33 = vsel %vm416_vm1, %v2747_v23, 0.0  ;;  %v812_v23 = vsel %vm417_vm9, %v2859_v3, 0.0 }
 0x180   :  { %1047 = vrot.lane.b32.xlu1 %v2375_v25, %s2097_s18  ;;  %1067 = vrot.lane.b32.xlu0 %v2514_v2, %s2097_s18 }
 0x181   :  { %1051 = vrot.lane.b32.xlu2 %v2236_v63, %s2097_s18  ;;  %1915 = vset.pattern.permute.xlu1 %v2098_v34 }
 0x182   :  { %v825_v30 = vpop.permute.xlu1 %824  ;;  %v821_v32 = vpop.permute.xlu0 %820 }
 0x183   :  { %v835_v9 = vmul.f32 %v825_v30, %v811_v53  ;;  %v836_v13 = vmul.f32 %v825_v30, %v812_v23  ;;  %v837_v52 = vmul.f32 %v825_v30, %v813_v55  ;;  %v838_v59 = vmul.f32 %v825_v30, %v814_v58  ;;  %v785_v36 = vpop.permute.xlu2 %784 }
 0x184   :  { %v831_v41 = vmul.f32 %v821_v32, %v807_v33  ;;  %v832_v31 = vmul.f32 %v821_v32, %v808_v0  ;;  %v833_v24 = vmul.f32 %v821_v32, %v809_v57  ;;  %v834_v62 = vmul.f32 %v821_v32, %v810_v5 }
 0x185   :  { %v3043_v16 = vadd.f32 %v835_v9, %v754_v37  ;;  %v3046_v17 = vadd.f32 %v836_v13, %v2842_v48  ;;  %v798_v46 = vsel %vm786_vm12, %v785_v36, %v2883_v18  ;;  %v3052_v3 = vadd.f32 %v837_v52, %v2924_v7  ;;  %v3956_v37 = vld [vmem:[#allocation16_spill] sm:$0xff]  ;;  %v3957_v18 = vld [vmem:[#allocation6_spill] sm:$0xff]  ;;  %v3958_v7 = vld [vmem:[#allocation5_spill] sm:$0xff] }
 0x186   :  { %v3055_v29 = vadd.f32 %v831_v41, %v2752_v1  ;;  %v3058_v8 = vadd.f32 %v832_v31, %v3954_v40  ;;  %v3061_v21 = vadd.f32 %v833_v24, %v3955_v42  ;;  %v3064_v15 = vadd.f32 %v834_v62, %v3956_v37  ;;  %v3959_v1 = vld [vmem:[#allocation7_spill] sm:$0xff]  ;;  %v3962_v40 = vld [vmem:[#allocation17_spill] sm:$0xff] }
 0x187   :  { %v3067_v48 = vadd.f32 %v838_v59, %v2961_v47  ;;  %v2100_v23 = vmov 8  }
 0x188   :  { %1057 = vrot.lane.b32.xlu1 %v3957_v18, %s2097_s18  ;;  %1138 = vrot.lane.b32.xlu0 %v3958_v7, %s2099_s21 }
 0x189   :  { %1059 = vrot.lane.b32.xlu2 %v3959_v1, %s2097_s18  ;;  %1919 = vset.pattern.permute.xlu0 %v2100_v23 }
 0x18a   :  { %v682_v38 = vpop.permute.xlu1 %681  ;;  %v864_v60 = vpop.permute.xlu0 %863 }
 0x18b   :  { %v695_v0 = vsel %vm689_vm4, %v676_v12, %v682_v38  ;;  %v3078_v57 = vpop.permute.xlu2 %861 }
 0x18c   :  { %v724_v33 = vsel %vm2539_vm5, %v695_v0, 0.0  ;;  %v3086_v5 = vsel %vm879_vm2, %v2997_v56, %v3078_v57  ;;  %vm972_vm5 = vcmp.lt.s32.totalorder %v2482_v44, 113 }
 0x18d   :  { %v748_v58 = vmul.f32 %v2528_v10, %v724_v33 }
 0x18f   :  { %v760_v53 = vadd.f32 %v748_v58, %v2977_v20 }
 0x190   :  { %1065 = vrot.lane.b32.xlu1 %v2413_v43, %s2097_s18  ;;  %1146 = vrot.lane.b32.xlu0 %v2368_v22, %s2099_s21 }
 0x191   :  { %1018 = vperm.xlu2 %1914, %v2905_v14  }
 0x192   :  { %v688_v12 = vpop.permute.xlu1 %687  ;;  %v874_v55 = vpop.permute.xlu0 %873 }
 0x193   :  { %v692_v30 = vsel %vm689_vm4, %v682_v38, %v688_v12  ;;  %v701_v20 = vsel %vm689_vm4, %v688_v12, %v2953_v28  ;;  %v3104_v32 = vsel %vm879_vm2, %v874_v55, %v2997_v56  ;;  %v870_v9 = vpop.permute.xlu2 %869  ;;  %vm3963_vm4 = vcmp.le.s32.totalorder %v3953_v50, 14 }
 0x194   :  { %v722_v22 = vsel %vm2624_vm14, %v701_v20, 0.0  ;;  %v725_v52 = vsel %vm423_vm6, %v692_v30, 0.0  ;;  %v884_v59 = vsel %vm879_vm2, %v864_v60, %v870_v9  ;;  %vm3965_vm8 = vmmov %vm3963_vm4 }
 0x195   :  { %v746_v41 = vmul.f32 %v2528_v10, %v722_v22  ;;  %v749_v31 = vmul.f32 %v2528_v10, %v725_v52  ;;  %v816_v10 = vsel %vm417_vm9, %v2921_v4, 0.0  ;;  %v905_v13 = vsel %vm421_vm13, %v884_v59, 0.0 }
 0x197   :  { %v758_v28 = vadd.f32 %v746_v41, %v3011_v39  ;;  %v761_v24 = vadd.f32 %v749_v31, %v3006_v35  ;;  %v815_v35 = vsel %vm416_vm1, %v798_v46, 0.0 }
 0x198   :  { %1055 = vrot.lane.b32.xlu1 %v2464_v26, %s2097_s18  ;;  %1156 = vrot.lane.b32.xlu0 %v2308_v45, %s2099_s21 }
 0x199   :  { %1061 = vrot.lane.b32.xlu2 %v2497_v54, %s2097_s18 }
 0x19a   :  { %v779_v56 = vpop.permute.xlu1 %778  ;;  %v3122_v62 = vpop.permute.xlu0 %859  ;;  %1916 = vset.pattern.permute.xlu2 %v2098_v34 }
 0x19b   :  { %v789_v39 = vsel %vm786_vm12, %v779_v56, %v785_v36  ;;  %v792_v45 = vsel %vm786_vm12, %v3962_v40, %v779_v56  ;;  %v829_v42 = vpop.permute.xlu2 %828  ;;  %vm3968_vm12 = vmmov %vm3963_vm4 }
 0x19c   :  { %v817_v37 = vsel %vm418_vm15, %v792_v45, 0.0  ;;  %v818_v34 = vsel %vm419_vm3, %v789_v39, 0.0  ;;  %v839_v7 = vmul.f32 %v829_v42, %v815_v35  ;;  %v840_v38 = vmul.f32 %v829_v42, %v816_v10 }
 0x19d   :  { %v841_v4 = vmul.f32 %v829_v42, %v817_v37  ;;  %v842_v0 = vmul.f32 %v829_v42, %v818_v34 }
 0x19e   :  { %v3138_v47 = vadd.f32 %v839_v7, %v758_v28  ;;  %v3141_v46 = vadd.f32 %v840_v38, %v3009_v19 }
 0x19f   :  { %v3143_v36 = vadd.f32 %v841_v4, %v760_v53  ;;  %v3145_v33 = vadd.f32 %v842_v0, %v761_v24 }
 0x1a0   :  { %1103 = vperm.xlu1 %1915, %v2821_v61   ;;  %1142 = vrot.lane.b32.xlu0 %v2447_v11, %s2099_s21 }
 0x1a1   :  { %1107 = vperm.xlu2 %1916, %v2829_v49  }
 0x1a2   :  { %v858_v58 = vpop.permute.xlu1 %857  ;;  %v878_v12 = vpop.permute.xlu0 %877 }
 0x1a3   :  { %v887_v30 = vsel %vm879_vm2, %v858_v58, %v864_v60  ;;  %v891_v19 = vsel %vm879_vm2, %v878_v12, %v3122_v62  ;;  %v872_v53 = vpop.permute.xlu2 %871 }
 0x1a4   :  { %v882_v20 = vsel %vm879_vm2, %v872_v53, %v878_v12  ;;  %v904_v22 = vsel %vm3963_vm4, %v887_v30, 0.0 }
 0x1a5   :  { %v910_v34 = vsel %vm3966_vm10, %v882_v20, 0.0 }
 0x1a8   :  { %1140 = vrot.lane.b32.xlu1 %v2375_v25, %s2099_s21  ;;  %1160 = vrot.lane.b32.xlu0 %v2514_v2, %s2099_s21 }
 0x1a9   :  { %1144 = vrot.lane.b32.xlu2 %v2236_v63, %s2099_s21  ;;  %1917 = vset.pattern.permute.xlu1 %v2100_v23 }
 0x1aa   :  { %v868_v11 = vpop.permute.xlu1 %867  ;;  %v949_v60 = vpop.permute.xlu0 %948 }
 0x1ab   :  { %v880_v52 = vsel %vm879_vm2, %v868_v11, %v874_v55  ;;  %v883_v25 = vsel %vm879_vm2, %v3078_v57, %v868_v11  ;;  %v918_v2 = vpop.permute.xlu2 %917 }
 0x1ac   :  { %v928_v41 = vmul.f32 %v918_v2, %v904_v22  ;;  %v929_v63 = vmul.f32 %v918_v2, %v905_v13  ;;  %v902_v7 = vsel %vm3967_vm11, %v880_v52, 0.0 }
 0x1ae   :  { %v3175_v31 = vadd.f32 %v928_v41, %v3043_v16  ;;  %v3178_v28 = vadd.f32 %v929_v63, %v3046_v17  ;;  %v3969_v41 = vld [vmem:[#allocation11_spill] sm:$0xff] }
 0x1af   :  { %v3970_v63 = vand.u32 255, %v3969_v41 }
 0x1b0   :  { %1150 = vrot.lane.b32.xlu1 %v3957_v18, %s2099_s21  ;;  %1208 = vperm.xlu0 %1919, %v2905_v14  }
 0x1b1   :  { %1152 = vrot.lane.b32.xlu2 %v3959_v1, %s2099_s21  ;;  %vm3278_vm14 = vcmp.lt.s32.totalorder %v3970_v63, 240 }
 0x1b2   :  { %v876_v57 = vpop.permute.xlu1 %875  ;;  %v957_v55 = vpop.permute.xlu0 %956  ;;  %vm3286_vm0 = vmand %vm3278_vm14, %vm417_vm9 }
 0x1b3   :  { %v881_v59 = vsel %vm879_vm2, %v870_v9, %v876_v57  ;;  %v890_v16 = vsel %vm879_vm2, %v876_v57, %v858_v58  ;;  %v3190_v17 = vpop.permute.xlu2 %954 }
 0x1b4   :  { %v906_v18 = vsel %vm3964_vm7, %v881_v59, 0.0  ;;  %v907_v24 = vsel %vm423_vm6, %v890_v16, 0.0  ;;  %v3199_v1 = vsel %vm972_vm5, %v949_v60, %v3190_v17 }
 0x1b5   :  { %v930_v56 = vmul.f32 %v918_v2, %v906_v18  ;;  %v931_v10 = vmul.f32 %v918_v2, %v907_v24 }
 0x1b7   :  { %v3202_v9 = vadd.f32 %v930_v56, %v3052_v3  ;;  %v3205_v35 = vadd.f32 %v931_v10, %v3067_v48 }
 0x1b8   :  { %1158 = vrot.lane.b32.xlu1 %v2413_v43, %s2099_s21  ;;  %v900_v43 = vsel %vm3965_vm8, %v3086_v5, 0.0 }
 0x1b9   :  { %1111 = vperm.xlu2 %1916, %v2905_v14   ;;  %v903_v14 = vsel %vm423_vm6, %v3104_v32, 0.0 }
 0x1ba   :  { %v866_v39 = vpop.permute.xlu1 %865  ;;  %v967_v40 = vpop.permute.xlu0 %966 }
 0x1bb   :  { %v885_v45 = vsel %vm879_vm2, %v866_v39, %v872_v53  ;;  %v888_v42 = vsel %vm879_vm2, %v3122_v62, %v866_v39  ;;  %v3217_v3 = vsel %vm972_vm5, %v967_v40, %v949_v60  ;;  %v963_v48 = vpop.permute.xlu2 %962  ;;  %v911_v62 = vsel %vm423_vm6, %v891_v19, 0.0 }
 0x1bc   :  { %v977_v37 = vsel %vm972_vm5, %v957_v55, %v963_v48  ;;  %v908_v5 = vsel %vm3968_vm12, %v888_v42, 0.0  ;;  %v909_v32 = vsel %vm421_vm13, %v885_v45, 0.0  ;;  %v3975_v42 = vld [vmem:[#allocation9_spill] sm:$0xff]  ;;  %vm1069_vm2 = vcmp.lt.s32.totalorder %v2482_v44, 112 }
 0x1c0   :  { %1148 = vrot.lane.b32.xlu1 %v2464_v26, %s2099_s21  ;;  %v901_v26 = vsel %vm421_vm13, %v883_v25, 0.0 }
 0x1c1   :  { %1154 = vrot.lane.b32.xlu2 %v2497_v54, %s2099_s21 }
 0x1c2   :  { %v914_v38 = vpop.permute.xlu1 %913  ;;  %v953_v4 = vpop.permute.xlu0 %952  ;;  %1918 = vset.pattern.permute.xlu2 %v2100_v23 }
 0x1c3   :  { %v924_v0 = vmul.f32 %v914_v38, %v900_v43  ;;  %v925_v58 = vmul.f32 %v914_v38, %v901_v26  ;;  %v926_v12 = vmul.f32 %v914_v38, %v902_v7  ;;  %v927_v54 = vmul.f32 %v914_v38, %v903_v14  ;;  %v922_v30 = vpop.permute.xlu2 %921 }
 0x1c4   :  { %v932_v19 = vmul.f32 %v922_v30, %v908_v5  ;;  %v933_v53 = vmul.f32 %v922_v30, %v909_v32  ;;  %v934_v20 = vmul.f32 %v922_v30, %v910_v34  ;;  %v935_v11 = vmul.f32 %v922_v30, %v911_v62 }
 0x1c5   :  { %v3245_v60 = vadd.f32 %v924_v0, %v3055_v29  ;;  %v3248_v13 = vadd.f32 %v925_v58, %v3058_v8  ;;  %v3251_v22 = vadd.f32 %v926_v12, %v3061_v21  ;;  %v3254_v23 = vadd.f32 %v927_v54, %v3064_v15 }
 0x1c6   :  { %v3257_v52 = vadd.f32 %v932_v19, %v3138_v47  ;;  %v3260_v25 = vadd.f32 %v933_v53, %v3141_v46  ;;  %v3263_v2 = vadd.f32 %v934_v20, %v3143_v36  ;;  %v3266_v29 = vadd.f32 %v935_v11, %v3145_v33 }
 0x1c8   :  { %1200 = vperm.xlu1 %1917, %v2821_v61  }
 0x1c9   :  { %1204 = vperm.xlu2 %1918, %v2829_v49  }
 0x1ca   :  { %v951_v8 = vpop.permute.xlu1 %950  ;;  %v971_v21 = vpop.permute.xlu0 %970 }
 0x1cb   :  { %v980_v15 = vsel %vm972_vm5, %v951_v8, %v957_v55  ;;  %v984_v47 = vsel %vm972_vm5, %v971_v21, %v953_v4  ;;  %v965_v46 = vpop.permute.xlu2 %964  ;;  %v1002_v55 = vsel %vm3286_vm0, %v977_v37, 0.0  ;;  %v3976_v37 = vand.u32 255, %v3975_v42 }
 0x1cc   :  { %v975_v36 = vsel %vm972_vm5, %v965_v46, %v971_v21  ;;  %v1001_v59 = vsel %vm416_vm1, %v980_v15, 0.0 }
 0x1cd   :  { %vm3307_vm9 = vcmp.lt.s32.totalorder %v3976_v37, 240  ;;  %v1007_v20 = vsel %vm418_vm15, %v975_v36, 0.0 }
 0x1ce   :  { %vm3318_vm4 = vmand %vm3307_vm9, %vm419_vm3  ;;  %vm1162_vm3 = vcmp.lt.s32.totalorder %v2482_v44, 111 }
 0x1cf   :  { %v1008_v53 = vsel %vm3318_vm4, %v984_v47, 0.0 }
 0x1d2   :  { %v961_v49 = vpop.permute.xlu1 %960  ;;  %v1046_v57 = vpop.permute.xlu0 %1045 }
 0x1d3   :  { %v973_v16 = vsel %vm972_vm5, %v961_v49, %v967_v40  ;;  %v976_v18 = vsel %vm972_vm5, %v3190_v17, %v961_v49  ;;  %v1015_v24 = vpop.permute.xlu2 %1014 }
 0x1d4   :  { %v1025_v56 = vmul.f32 %v1015_v24, %v1001_v59  ;;  %v1026_v10 = vmul.f32 %v1015_v24, %v1002_v55  ;;  %v999_v11 = vsel %vm418_vm15, %v973_v16, 0.0 }
 0x1d6   :  { %v3300_v39 = vadd.f32 %v1025_v56, %v3175_v31  ;;  %v3303_v45 = vadd.f32 %v1026_v10, %v3178_v28 }
 0x1da   :  { %v969_v40 = vpop.permute.xlu1 %968  ;;  %v3312_v14 = vpop.permute.xlu0 %1053 }
 0x1db   :  { %v974_v28 = vsel %vm972_vm5, %v963_v48, %v969_v40  ;;  %v983_v17 = vsel %vm972_vm5, %v969_v40, %v951_v8  ;;  %v1052_v62 = vpop.permute.xlu2 %1051 }
 0x1dc   :  { %v1003_v34 = vsel %vm418_vm15, %v974_v28, 0.0  ;;  %v1004_v26 = vsel %vm3318_vm4, %v983_v17, 0.0  ;;  %v3332_v7 = vsel %vm1069_vm2, %v1046_v57, %v1052_v62  ;;  %vm3456_vm15 = vmand %vm3278_vm14, %vm421_vm13 }
 0x1dd   :  { %v1027_v5 = vmul.f32 %v1015_v24, %v1003_v34  ;;  %v1028_v32 = vmul.f32 %v1015_v24, %v1004_v26  ;;  %vm3985_vm13 = vmmov %vm3964_vm7 }
 0x1df   :  { %v1039_v38 = vadd.f32 %v1027_v5, %v3202_v9  ;;  %v3336_v48 = vadd.f32 %v1028_v32, %v3205_v35  ;;  %v997_v9 = vsel %vm416_vm1, %v3199_v1, 0.0  ;;  %v1000_v35 = vsel %vm3318_vm4, %v3217_v3, 0.0 }
 0x1e2   :  { %v959_v0 = vpop.permute.xlu1 %958  ;;  %v1064_v58 = vpop.permute.xlu0 %1063 }
 0x1e3   :  { %v978_v12 = vsel %vm972_vm5, %v959_v0, %v965_v46  ;;  %v981_v54 = vsel %vm972_vm5, %v953_v4, %v959_v0  ;;  %v1079_v30 = vsel %vm1069_vm2, %v1064_v58, %v1046_v57  ;;  %v3344_v19 = vpop.permute.xlu2 %1059  ;;  %v998_v4 = vsel %vm3286_vm0, %v976_v18, 0.0  ;;  %vm3987_vm5 = vmmov %vm3964_vm7 }
 0x1e4   :  { %v1005_v8 = vsel %vm416_vm1, %v981_v54, 0.0  ;;  %v1006_v1 = vsel %vm3286_vm0, %v978_v12, 0.0  ;;  %v1093_v0 = vsel %vm3307_vm9, %v1079_v30, 0.0  ;;  %vm3469_vm1 = vmand %vm3307_vm9, %vm423_vm6 }
 0x1e5   :  { %vm3986_vm6 = vmmov %vm3965_vm8 }
 0x1e6   :  { %vm3988_vm7 = vmmov %vm3986_vm6 }
 0x1e7   :  { %vm3989_vm8 = vmmov %vm3986_vm6 }
 0x1e8   :  { %vm3990_vm10 = vmmov %vm3987_vm5 }
 0x1ea   :  { %v1011_v21 = vpop.permute.xlu1 %1010  ;;  %v3364_v3 = vpop.permute.xlu0 %1049 }
 0x1eb   :  { %v1021_v15 = vmul.f32 %v1011_v21, %v997_v9  ;;  %v1022_v47 = vmul.f32 %v1011_v21, %v998_v4  ;;  %v1023_v46 = vmul.f32 %v1011_v21, %v999_v11  ;;  %v1024_v41 = vmul.f32 %v1011_v21, %v1000_v35  ;;  %v1019_v36 = vpop.permute.xlu2 %1018 }
 0x1ec   :  { %v1029_v63 = vmul.f32 %v1019_v36, %v1005_v8  ;;  %v1030_v49 = vmul.f32 %v1019_v36, %v1006_v1  ;;  %v1031_v57 = vmul.f32 %v1019_v36, %v1007_v20  ;;  %v1032_v55 = vmul.f32 %v1019_v36, %v1008_v53 }
 0x1ed   :  { %v1033_v59 = vadd.f32 %v1021_v15, %v3245_v60  ;;  %v1034_v16 = vadd.f32 %v1022_v47, %v3248_v13  ;;  %v1035_v18 = vadd.f32 %v1023_v46, %v3251_v22  ;;  %v1036_v61 = vadd.f32 %v1024_v41, %v3254_v23 }
 0x1ee   :  { %v1041_v24 = vadd.f32 %v1029_v63, %v3257_v52  ;;  %v1042_v56 = vadd.f32 %v1030_v49, %v3260_v25  ;;  %v1043_v10 = vadd.f32 %v1031_v57, %v3263_v2  ;;  %v3374_v42 = vadd.f32 %v1032_v55, %v3266_v29 }
 0x1f2   :  { %v3376_v37 = vpop.permute.xlu1 %1047  ;;  %v1068_v40 = vpop.permute.xlu0 %1067 }
 0x1f3   :  { %v1062_v31 = vpop.permute.xlu2 %1061 }
 0x1fa   :  { %v1058_v60 = vpop.permute.xlu1 %1057  ;;  %v3378_v28 = vpop.permute.xlu0 %1138 }
 0x1fb   :  { %v1070_v13 = vsel %vm1069_vm2, %v1058_v60, %v1064_v58  ;;  %v1073_v22 = vsel %vm1069_vm2, %v1052_v62, %v1058_v60  ;;  %v3384_v23 = vpop.permute.xlu2 %1107  ;;  %v1072_v58 = vsel %vm1069_vm2, %v1062_v31, %v1068_v40 }
 0x1fc   :  { %v1091_v12 = vsel %vm3278_vm14, %v1073_v22, 0.0 }
 0x202   :  { %v1066_v52 = vpop.permute.xlu1 %1065  ;;  %v1147_v25 = vpop.permute.xlu0 %1146 }
 0x203   :  { %v1071_v2 = vsel %vm1069_vm2, %v3344_v19, %v1066_v52  ;;  %v3389_v29 = vpop.permute.xlu2 %1144 }
 0x204   :  { %v1120_v17 = vmul.f32 %v3384_v23, %v1071_v2 }
 0x206   :  { %v3392_v34 = vadd.f32 %v1120_v17, %v1039_v38 }
 0x20a   :  { %v1056_v26 = vpop.permute.xlu1 %1055  ;;  %v3394_v5 = vpop.permute.xlu0 %1156 }
 0x20b   :  { %v3396_v32 = vpop.permute.xlu2 %1152  ;;  %v1075_v62 = vsel %vm1069_vm2, %v1056_v26, %v1062_v31  ;;  %v1078_v38 = vsel %vm1069_vm2, %v3364_v3, %v1056_v26 }
 0x20c   :  { %v1099_v54 = vsel %vm3278_vm14, %v1075_v62, 0.0 }
 0x212   :  { %v1104_v9 = vpop.permute.xlu1 %1103  ;;  %v3411_v35 = vpop.permute.xlu0 %1142 }
 0x213   :  { %v1114_v53 = vmul.f32 %v1104_v9, %v3332_v7  ;;  %v1115_v20 = vmul.f32 %v1104_v9, %v1091_v12  ;;  %v1116_v30 = vmul.f32 %v1104_v9, %v1070_v13  ;;  %v1117_v4 = vmul.f32 %v1104_v9, %v1093_v0  ;;  %v1112_v11 = vpop.permute.xlu2 %1111 }
 0x214   :  { %v1122_v8 = vmul.f32 %v1112_v11, %v1078_v38  ;;  %v1123_v1 = vmul.f32 %v1112_v11, %v1099_v54  ;;  %v1124_v21 = vmul.f32 %v1112_v11, %v1072_v58  ;;  %v1074_v7 = vsel %vm1069_vm2, %v3312_v14, %v3344_v19 }
 0x215   :  { %v3414_v15 = vadd.f32 %v1116_v30, %v1035_v18  ;;  %v3416_v47 = vadd.f32 %v1117_v4, %v1036_v61  ;;  %v3418_v46 = vadd.f32 %v1114_v53, %v1033_v59  ;;  %v3420_v41 = vadd.f32 %v1115_v20, %v1034_v16 }
 0x216   :  { %v1136_v36 = vadd.f32 %v1124_v21, %v1043_v10  ;;  %v3422_v63 = vadd.f32 %v1122_v8, %v1041_v24  ;;  %v3424_v49 = vadd.f32 %v1123_v1, %v1042_v56  ;;  %v1081_v59 = vsel %vm1069_vm2, %v1068_v40, %v3364_v3 }
 0x217   :  { %v1095_v16 = vsel %vm3278_vm14, %v1074_v7, 0.0  ;;  %v1077_v61 = vsel %vm1069_vm2, %v3376_v37, %v3312_v14  ;;  %v1101_v56 = vsel %vm3307_vm9, %v1081_v59, 0.0  ;;  %v1167_v40 = vsel %vm1162_vm3, %v1147_v25, %v3396_v32 }
 0x218   :  { %v1118_v24 = vmul.f32 %v3384_v23, %v1077_v61  ;;  %v1119_v19 = vmul.f32 %v3384_v23, %v1095_v16  ;;  %v1125_v31 = vmul.f32 %v1112_v11, %v1101_v56  ;;  %v1192_v27 = vsel %vm3456_vm15, %v1167_v40, 0.0 }
 0x219   :  { %v1080_v12 = vsel %vm1069_vm2, %v1066_v52, %v3376_v37  ;;  %v1169_v56 = vsel %vm1162_vm3, %v3378_v28, %v3389_v29 }
 0x21a   :  { %v1141_v57 = vpop.permute.xlu1 %1140  ;;  %v1161_v55 = vpop.permute.xlu0 %1160  ;;  %v1130_v17 = vadd.f32 %v1118_v24, %v3300_v39  ;;  %v1137_v39 = vadd.f32 %v1125_v31, %v3374_v42  ;;  %v1097_v30 = vsel %vm3307_vm9, %v1080_v12, 0.0 }
 0x21b   :  { %v3430_v18 = vpop.permute.xlu2 %1154  ;;  %v1174_v3 = vsel %vm1162_vm3, %v1161_v55, %v3411_v35  ;;  %v1170_v60 = vsel %vm1162_vm3, %v1141_v57, %v1147_v25  ;;  %v1131_v25 = vadd.f32 %v1119_v19, %v3303_v45  ;;  %v1121_v42 = vmul.f32 %v3384_v23, %v1097_v30 }
 0x21c   :  { %v1165_v10 = vsel %vm1162_vm3, %v3430_v18, %v1161_v55  ;;  %v1198_v33 = vsel %vm3469_vm1, %v1174_v3, 0.0  ;;  %v1191_v26 = vsel %vm3986_vm6, %v1170_v60, 0.0 }
 0x21d   :  { %v1197_v13 = vsel %vm3985_vm13, %v1165_v10, 0.0  ;;  %v1133_v55 = vadd.f32 %v1121_v42, %v3336_v48  ;;  %v1172_v48 = vsel %vm1162_vm3, %v3394_v5, %v3378_v28 }
 0x222   :  { %v1151_v22 = vpop.permute.xlu1 %1150  ;;  %v3477_v2 = vpop.permute.xlu0 %1208 }
 0x223   :  { %v1221_v62 = vmul.f32 %v3477_v2, %v1197_v13  ;;  %v1222_v0 = vmul.f32 %v3477_v2, %v1198_v33  ;;  %v1205_v58 = vpop.permute.xlu2 %1204  ;;  %v3539_v10 = vsel %vm1162_vm3, %v3389_v29, %v1151_v22  ;;  %v1187_v13 = vsel %vm3988_vm7, %v1169_v56, 0.0 }
 0x224   :  { %v1215_v38 = vmul.f32 %v1205_v58, %v1191_v26  ;;  %v1216_v54 = vmul.f32 %v1205_v58, %v1192_v27  ;;  %v1163_v29 = vsel %vm1162_vm3, %v1151_v22, %v3394_v5 }
 0x225   :  { %v3491_v45 = vadd.f32 %v1221_v62, %v1136_v36  ;;  %v3497_v20 = vadd.f32 %v1222_v0, %v1137_v39  ;;  %v1189_v6 = vsel %vm3990_vm10, %v1163_v29, 0.0 }
 0x226   :  { %v3493_v9 = vadd.f32 %v1215_v38, %v1130_v17  ;;  %v3495_v53 = vadd.f32 %v1216_v54, %v1131_v25  ;;  %v1188_v17 = vsel %vm3456_vm15, %v3539_v10, 0.0 }
 0x227   :  { %v1861_v4 = vmul.f32 -1.442695, %v3491_v45  ;;  %v1862_v8 = vmul.f32 -1.442695, %v3497_v20 }
 0x228   :  { %v1855_v11 = vmul.f32 -1.442695, %v3493_v9  ;;  %v1856_v37 = vmul.f32 -1.442695, %v3495_v53 }
 0x229   :  { %1983 = vpow2.f32 %v1861_v4 }
 0x22a   :  { %v1159_v52 = vpop.permute.xlu1 %1158  ;;  %1985 = vpow2.f32 %v1855_v11 }
 0x22b   :  { %v1164_v1 = vsel %vm1162_vm3, %v3396_v32, %v1159_v52  ;;  %v1173_v43 = vsel %vm1162_vm3, %v1159_v52, %v1141_v57  ;;  %1987 = vpow2.f32 %v1856_v37 }
 0x22c   :  { %v1193_v21 = vsel %vm3987_vm5, %v1164_v1, 0.0  ;;  %v1194_v36 = vsel %vm3469_vm1, %v1173_v43, 0.0  ;;  %1989 = vpow2.f32 %v1862_v8 }
 0x22d   :  { %v1217_v7 = vmul.f32 %v1205_v58, %v1193_v21  ;;  %v1218_v23 = vmul.f32 %v1205_v58, %v1194_v36 }
 0x22f   :  { %v1984_v59 = vpop.eup %1983  ;;  %v3517_v16 = vadd.f32 %v1217_v7, %v3392_v34  ;;  %v3519_v61 = vadd.f32 %v1218_v23, %v1133_v55 }
 0x230   :  { %v1986_v32 = vpop.eup %1985  ;;  %v3521_v57 = vadd.f32 1.0, %v1984_v59 }
 0x231   :  { %v1988_v24 = vpop.eup %1987  ;;  %v3523_v19 = vadd.f32 1.0, %v1986_v32  ;;  %v1857_v31 = vmul.f32 -1.442695, %v3517_v16  ;;  %v1858_v33 = vmul.f32 -1.442695, %v3519_v61 }
 0x232   :  { %v1149_v34 = vpop.permute.xlu1 %1148  ;;  %v3533_v3 = vadd.f32 1.0, %v1988_v24  ;;  %1991 = vrcp.f32 %v3521_v57  ;;  %v1990_v60 = vpop.eup %1989  ;;  %v1442_v50 = vand.u32 2147483647, %v3521_v57  ;;  %v1444_v11 = vand.u32 2147483648, %v3521_v57 }
 0x233   :  { %v1171_v40 = vsel %vm1162_vm3, %v3411_v35, %v1149_v34  ;;  %1993 = vrcp.f32 %v3523_v19  ;;  %v1168_v28 = vsel %vm1162_vm3, %v1149_v34, %v3430_v18  ;;  %v1190_v35 = vsel %vm3469_vm1, %v1172_v48, 0.0 }
 0x234   :  { %1995 = vrcp.f32 %v3533_v3  ;;  %v1195_v18 = vsel %vm3989_vm8, %v1171_v40, 0.0  ;;  %v1352_v25 = vand.u32 2147483647, %v3523_v19  ;;  %v1196_v27 = vsel %vm3456_vm15, %v1168_v28, 0.0 }
 0x235   :  { %v1354_v44 = vand.u32 2147483648, %v3523_v19  ;;  %1997 = vpow2.f32 %v1857_v31  ;;  %v3567_v5 = vadd.f32 1.0, %v1990_v60  ;;  %vm1348_vm11 = vweird.f32 %v3523_v19 }
 0x236   :  { %1999 = vpow2.f32 %v1858_v33  ;;  %v1219_v62 = vmul.f32 %v3477_v2, %v1195_v18  ;;  %v1367_v14 = vand.u32 2147483647, %v3533_v3  ;;  %v1369_v0 = vand.u32 2147483648, %v3533_v3 }
 0x237   :  { %v3581_v12 = vmul.f32 %v3477_v2, %v1196_v27  ;;  %vm3584_vm12 = vcmp.eq.f32.partialorder %v1352_v25, 8.507059e+37  ;;  %vm1363_vm14 = vweird.f32 %v3533_v3  ;;  %v1355_v4 = vor.u32 1.1754944e-38, %v1354_v44 }
 0x238   :  { %v3569_v22 = vpop.eup %1991  ;;  %2001 = vrcp.f32 %v3567_v5  ;;  %vm3592_vm9 = vcmp.eq.f32.partialorder %v1367_v14, 8.507059e+37  ;;  %v1370_v43 = vor.u32 1.1754944e-38, %v1369_v0  ;;  %vm1438_vm2 = vweird.f32 %v3521_v57 }
 0x239   :  { %v1994_v26 = vpop.eup %1993  ;;  %v1434_v58 = vmul.f32 %v3569_v22, %v3521_v57  ;;  %v3598_v21 = vadd.f32 %v1219_v62, %v3422_v63  ;;  %v1459_v56 = vand.u32 2147483648, %v3567_v5  ;;  %vm1439_vm15 = vweird.f32 %v3569_v22 }
 0x23a   :  { %v1201_v51 = vpop.permute.xlu1 %1200  ;;  %v1344_v38 = vmul.f32 %v1994_v26, %v3523_v19  ;;  %v1996_v39 = vpop.eup %1995  ;;  %vm1349_vm0 = vweird.f32 %v1994_v26  ;;  %v1457_v40 = vand.u32 2147483647, %v3567_v5  ;;  %vm1453_vm13 = vweird.f32 %v3567_v5  ;;  %vm3656_vm7 = vmor %vm1438_vm2, %vm1439_vm15 }
 0x23b   :  { %v1213_v30 = vmul.f32 %v1201_v51, %v1189_v6  ;;  %v1214_v37 = vmul.f32 %v1201_v51, %v1190_v35  ;;  %v1359_v2 = vmul.f32 %v1996_v39, %v3533_v3  ;;  %v1435_v52 = vsub.f32 1.0, %v1434_v58  ;;  %v1998_v8 = vpop.eup %1997  ;;  %vm1350_vm3 = vmor %vm1348_vm11, %vm1349_vm0 }
 0x23c   :  { %v1345_v42 = vsub.f32 1.0, %v1344_v38  ;;  %v2000_v36 = vpop.eup %1999  ;;  %v3600_v55 = vadd.f32 1.0, %v1998_v8  ;;  %vm1364_vm4 = vweird.f32 %v1996_v39  ;;  %v1211_v31 = vmul.f32 %v1201_v51, %v1187_v13 }
 0x23d   :  { %v1360_v23 = vsub.f32 1.0, %v1359_v2  ;;  %v3603_v59 = vadd.f32 %v1213_v30, %v3414_v15  ;;  %v3605_v32 = vadd.f32 1.0, %v2000_v36  ;;  %v1436_v24 = vmul.f32 %v3569_v22, %v1435_v52  ;;  %vm1365_vm1 = vmor %vm1363_vm14, %vm1364_vm4 }
 0x23e   :  { %v1346_v7 = vmul.f32 %v1994_v26, %v1345_v42  ;;  %2003 = vrcp.f32 %v3600_v55  ;;  %v3611_v63 = vadd.f32 %v1214_v37, %v3416_v47  ;;  %v3613_v10 = vpop.eup %2001  ;;  %v3620_v15 = vor.u32 1.1754944e-38, %v1444_v11 }
 0x23f   :  { %v1361_v34 = vmul.f32 %v1996_v39, %v1360_v23  ;;  %2005 = vrcp.f32 %v3605_v32  ;;  %v1853_v47 = vmul.f32 -1.442695, %v3603_v59  ;;  %v1212_v33 = vmul.f32 %v1201_v51, %v1188_v17 }
 0x240   :  { %v1347_v48 = vadd.f32 %v1994_v26, %v1346_v7  ;;  %v1382_v19 = vand.u32 2147483647, %v3600_v55  ;;  %v3631_v35 = vadd.f32 %v3569_v22, %v1436_v24  ;;  %v3637_v25 = vor.u32 1.1754944e-38, %v1459_v56 }
 0x241   :  { %v1362_v28 = vadd.f32 %v1996_v39, %v1361_v34  ;;  %v1854_v17 = vmul.f32 -1.442695, %v3611_v63  ;;  %vm1378_vm6 = vweird.f32 %v3600_v55  ;;  %v1384_v3 = vand.u32 2147483648, %v3600_v55 }
 0x242   :  { %v1351_v60 = vsel %vm1350_vm3, %v1994_v26, %v1347_v48  ;;  %v1397_v44 = vand.u32 2147483647, %v3605_v32  ;;  %v1449_v6 = vmul.f32 %v3613_v10, %v3567_v5  ;;  %vm1393_vm5 = vweird.f32 %v3605_v32 }
 0x243   :  { %v1356_v29 = vsel %vm3584_vm12, %v1355_v4, %v1351_v60  ;;  %v1366_v13 = vsel %vm1365_vm1, %v1996_v39, %v1362_v28  ;;  %v1399_v62 = vand.u32 2147483648, %v3605_v32  ;;  %2007 = vpow2.f32 %v1853_v47 }
 0x244   :  { %v3635_v18 = vmul.f32 %v1356_v29, %v3493_v9  ;;  %v1371_v27 = vsel %vm3592_vm9, %v1370_v43, %v1366_v13  ;;  %v2004_v26 = vpop.eup %2003  ;;  %v3661_v0 = vadd.f32 %v1211_v31, %v3418_v46  ;;  %vm3664_vm8 = vcmp.eq.f32.partialorder %v1382_v19, 8.507059e+37 }
 0x245   :  { %v3648_v9 = vmul.f32 %v1371_v27, %v3495_v53  ;;  %v2006_v58 = vpop.eup %2005  ;;  %v1374_v53 = vmul.f32 %v2004_v26, %v3600_v55  ;;  %v1441_v38 = vsel %vm3656_vm7, %v3569_v22, %v3631_v35  ;;  %vm3674_vm10 = vcmp.eq.f32.partialorder %v1442_v50, 8.507059e+37 }
 0x246   :  { %v1450_v46 = vsub.f32 1.0, %v1449_v6  ;;  %vm3678_vm11 = vcmp.eq.f32.partialorder %v1457_v40, 8.507059e+37  ;;  %v1389_v4 = vmul.f32 %v2006_v58, %v3605_v32  ;;  %vm1454_vm12 = vweird.f32 %v3613_v10 }
 0x247   :  { %v1478_v30 = vadd.f32 %v3648_v9, %v3635_v18  ;;  %2009 = vpow2.f32 %v1854_v17  ;;  %v1375_v22 = vsub.f32 1.0, %v1374_v53  ;;  %v3688_v50 = vadd.f32 %v1212_v33, %v3420_v41  ;;  %vm3702_vm9 = vmor %vm1453_vm13, %vm1454_vm12 }
 0x248   :  { %v1451_v57 = vmul.f32 %v3613_v10, %v1450_v46  ;;  %v1851_v11 = vmul.f32 -1.442695, %v3661_v0  ;;  %vm1379_vm14 = vweird.f32 %v2004_v26  ;;  %v1390_v37 = vsub.f32 1.0, %v1389_v4 }
 0x249   :  { %1479 = vadd.xlane.f32.xlu2 %v1478_v30  ;;  %v3693_v42 = vadd.f32 %v3581_v12, %v3424_v49  ;;  %v1859_v2 = vmul.f32 -1.442695, %v3598_v21  ;;  %v1376_v52 = vmul.f32 %v2004_v26, %v1375_v22  ;;  %v1852_v1 = vmul.f32 -1.442695, %v3688_v50  ;;  %v2008_v43 = vpop.eup %2007  ;;  %vm1380_vm2 = vmor %vm1378_vm6, %vm1379_vm14 }
 0x24a   :  { %v1452_v8 = vadd.f32 %v3613_v10, %v1451_v57  ;;  %2011 = vpow2.f32 %v1851_v11  ;;  %v1391_v41 = vmul.f32 %v2006_v58, %v1390_v37  ;;  %vm1394_vm0 = vweird.f32 %v2006_v58 }
 0x24b   :  { %2013 = vpow2.f32 %v1859_v2  ;;  %v1860_v49 = vmul.f32 -1.442695, %v3693_v42  ;;  %v1377_v12 = vadd.f32 %v2004_v26, %v1376_v52  ;;  %v3710_v23 = vadd.f32 1.0, %v2008_v43  ;;  %vm1395_vm3 = vmor %vm1393_vm5, %vm1394_vm0 }
 0x24c   :  { %v1456_v7 = vsel %vm3702_vm9, %v3613_v10, %v1452_v8  ;;  %2015 = vpow2.f32 %v1852_v1  ;;  %v1385_v5 = vor.u32 1.1754944e-38, %v1384_v3  ;;  %v1392_v56 = vadd.f32 %v2006_v58, %v1391_v41 }
 0x24d   :  { %v2010_v24 = vpop.eup %2009  ;;  %vm1398_vm4 = vcmp.eq.f32.partialorder %v1397_v44, 8.507059e+37  ;;  %2017 = vpow2.f32 %v1860_v49  ;;  %v1381_v48 = vsel %vm1380_vm2, %v2004_v26, %v1377_v12  ;;  %v1400_v34 = vor.u32 1.1754944e-38, %v1399_v62 }
 0x24e   :  { %v3718_v40 = vadd.f32 1.0, %v2010_v24  ;;  %2019 = vrcp.f32 %v3710_v23  ;;  %v1386_v10 = vsel %vm3664_vm8, %v1385_v5, %v1381_v48  ;;  %v1396_v31 = vsel %vm1395_vm3, %v2006_v58, %v1392_v56 }
 0x24f   :  { %v1446_v55 = vsel %vm3674_vm10, %v3620_v15, %v1441_v38  ;;  %v1461_v60 = vsel %vm3678_vm11, %v3637_v25, %v1456_v7  ;;  %v1401_v32 = vsel %vm1398_vm4, %v1400_v34, %v1396_v31  ;;  %v3730_v47 = vmul.f32 %v1386_v10, %v3517_v16 }
 0x250   :  { %v2012_v28 = vpop.eup %2011  ;;  %v3733_v29 = vmul.f32 %v1401_v32, %v3519_v61  ;;  %2021 = vrcp.f32 %v3718_v40  ;;  %v3737_v35 = vmul.f32 %v1446_v55, %v3491_v45  ;;  %v3740_v15 = vmul.f32 %v1461_v60, %v3497_v20 }
 0x251   :  { %v2014_v33 = vpop.eup %2013  ;;  %v1322_v13 = vand.u32 2147483647, %v3710_v23  ;;  %v3743_v25 = vadd.f32 1.0, %v2012_v28  ;;  %v1324_v3 = vand.u32 2147483648, %v3710_v23  ;;  %v1337_v44 = vand.u32 2147483647, %v3718_v40 }
 0x252   :  { %v2016_v19 = vpop.eup %2015  ;;  %v1487_v16 = vadd.f32 %v3733_v29, %v3730_v47  ;;  %v2101_v45 = vmov 13   ;;  %v3753_v6 = vadd.f32 1.0, %v2014_v33  ;;  %v1490_v26 = vadd.f32 %v3740_v15, %v3737_v35 }
 0x253   :  { %v2018_v17 = vpop.eup %2017  ;;  %v3747_v27 = vadd.f32 1.0, %v2016_v19  ;;  %2023 = vrcp.f32 %v3743_v25  ;;  %1922 = vset.pattern.permute.xlu0 %v2101_v45  ;;  %1921 = vset.pattern.permute.xlu2 %v2101_v45  ;;  %vm1318_vm15 = vweird.f32 %v3710_v23  ;;  %vm3758_vm1 = vcmp.eq.f32.partialorder %v1322_v13, 8.507059e+37 }
 0x254   :  { %v2020_v61 = vpop.eup %2019  ;;  %1488 = vadd.xlane.f32.xlu2 %v1487_v16  ;;  %1920 = vset.pattern.permute.xlu1 %v2101_v45  ;;  %vm1333_vm13 = vweird.f32 %v3718_v40  ;;  %v1339_v53 = vand.u32 2147483648, %v3718_v40  ;;  %v3765_v51 = vadd.f32 1.0, %v2018_v17  ;;  %v1325_v38 = vor.u32 1.1754944e-38, %v1324_v3 }
 0x255   :  { %v1314_v20 = vmul.f32 %v2020_v61, %v3710_v23  ;;  %2025 = vrcp.f32 %v3747_v27  ;;  %vm3768_vm6 = vcmp.eq.f32.partialorder %v1337_v44, 8.507059e+37  ;;  %v1292_v39 = vand.u32 2147483647, %v3743_v25 }
 0x256   :  { %v2022_v14 = vpop.eup %2021  ;;  %vm1319_vm5 = vweird.f32 %v2020_v61  ;;  %v1294_v4 = vand.u32 2147483648, %v3743_v25  ;;  %2027 = vrcp.f32 %v3753_v6  ;;  %v1307_v11 = vand.u32 2147483647, %v3747_v27 }
 0x257   :  { %v1315_v58 = vsub.f32 1.0, %v1314_v20  ;;  %v1329_v54 = vmul.f32 %v2022_v14, %v3718_v40  ;;  %v1309_v37 = vand.u32 2147483648, %v3747_v27  ;;  %2029 = vrcp.f32 %v3765_v51  ;;  %vm1320_vm8 = vmor %vm1318_vm15, %vm1319_vm5 }
 0x258   :  { %v1340_v52 = vor.u32 1.1754944e-38, %v1339_v53  ;;  %vm1288_vm7 = vweird.f32 %v3743_v25  ;;  %vm1334_vm10 = vweird.f32 %v2022_v14  ;;  %vm3782_vm11 = vcmp.eq.f32.partialorder %v1292_v39, 8.507059e+37 }
 0x259   :  { %v1316_v30 = vmul.f32 %v2020_v61, %v1315_v58  ;;  %v2024_v22 = vpop.eup %2023  ;;  %v1330_v57 = vsub.f32 1.0, %v1329_v54  ;;  %vm1303_vm12 = vweird.f32 %v3747_v27  ;;  %v1295_v12 = vor.u32 1.1754944e-38, %v1294_v4  ;;  %vm1335_vm0 = vmor %vm1333_vm13, %vm1334_vm10 }
 0x25a   :  { %v1284_v8 = vmul.f32 %v2024_v22, %v3743_v25  ;;  %vm3790_vm14 = vcmp.eq.f32.partialorder %v1307_v11, 8.507059e+37  ;;  %v1310_v56 = vor.u32 1.1754944e-38, %v1309_v37  ;;  %vm1289_vm9 = vweird.f32 %v2024_v22  ;;  %v2050_v11 = vld [vmem:[%s3893_s3 + $0x8] sm:$0xff]  ;;  %v2051_v37 = vld [vmem:[%s3893_s3 + $0x10] sm:$0xff] }
 0x25b   :  { %v1317_v2 = vadd.f32 %v2020_v61, %v1316_v30  ;;  %v2026_v1 = vpop.eup %2025  ;;  %v1331_v43 = vmul.f32 %v2022_v14, %v1330_v57  ;;  %v1412_v31 = vand.u32 2147483647, %v3753_v6  ;;  %vm1290_vm4 = vmor %vm1288_vm7, %vm1289_vm9  ;;  %v1429_v20 = vand.u32 2147483648, %v3765_v51 }
 0x25c   :  { %1491 = vadd.xlane.f32.xlu2 %v1490_v26  ;;  %v1285_v49 = vsub.f32 1.0, %v1284_v8  ;;  %v1299_v7 = vmul.f32 %v2026_v1, %v3747_v27  ;;  %v2028_v48 = vpop.eup %2027  ;;  %vm1304_vm2 = vweird.f32 %v2026_v1  ;;  %vm1408_vm13 = vweird.f32 %v3753_v6 }
 0x25d   :  { %v1321_v36 = vsel %vm1320_vm8, %v2020_v61, %v1317_v2  ;;  %v1332_v5 = vadd.f32 %v2022_v14, %v1331_v43  ;;  %v2030_v55 = vpop.eup %2029  ;;  %v1404_v32 = vmul.f32 %v2028_v48, %v3753_v6  ;;  %v1427_v61 = vand.u32 2147483647, %v3765_v51  ;;  %vm1305_vm3 = vmor %vm1303_vm12, %vm1304_vm2 }
 0x25e   :  { %v1326_v24 = vsel %vm3758_vm1, %v1325_v38, %v1321_v36  ;;  %v1286_v34 = vmul.f32 %v2024_v22, %v1285_v49  ;;  %v1300_v10 = vsub.f32 1.0, %v1299_v7  ;;  %v1419_v40 = vmul.f32 %v2030_v55, %v3765_v51 }
 0x25f   :  { %v1336_v60 = vsel %vm1335_vm0, %v2022_v14, %v1332_v5  ;;  %v3798_v28 = vmul.f32 %v1326_v24, %v3603_v59  ;;  %v1405_v16 = vsub.f32 1.0, %v1404_v32  ;;  %v1414_v59 = vand.u32 2147483648, %v3753_v6 }
 0x260   :  { %v1341_v33 = vsel %vm3768_vm6, %v1340_v52, %v1336_v60  ;;  %v1287_v19 = vadd.f32 %v2024_v22, %v1286_v34  ;;  %v1301_v13 = vmul.f32 %v2026_v1, %v1300_v10  ;;  %v1420_v45 = vsub.f32 1.0, %v1419_v40 }
 0x261   :  { %v3805_v17 = vmul.f32 %v1341_v33, %v3611_v63  ;;  %v1406_v25 = vmul.f32 %v2028_v48, %v1405_v16  ;;  %vm1409_vm15 = vweird.f32 %v2028_v48  ;;  %vm1424_vm1 = vweird.f32 %v2030_v55 }
 0x262   :  { %v1291_v3 = vsel %vm1290_vm4, %v2024_v22, %v1287_v19  ;;  %v1302_v44 = vadd.f32 %v2026_v1, %v1301_v13  ;;  %v1421_v58 = vmul.f32 %v2030_v55, %v1420_v45  ;;  %vm1410_vm6 = vmor %vm1408_vm13, %vm1409_vm15  ;;  %vm1423_vm5 = vweird.f32 %v3765_v51 }
 0x263   :  { %v1484_v26 = vadd.f32 %v3805_v17, %v3798_v28  ;;  %v1296_v63 = vsel %vm3782_vm11, %v1295_v12, %v1291_v3  ;;  %v1407_v38 = vadd.f32 %v2028_v48, %v1406_v25  ;;  %v1415_v39 = vor.u32 1.1754944e-38, %v1414_v59  ;;  %vm1425_vm7 = vmor %vm1423_vm5, %vm1424_vm1 }
 0x264   :  { %v1306_v62 = vsel %vm1305_vm3, %v2026_v1, %v1302_v44  ;;  %v3820_v14 = vmul.f32 %v1296_v63, %v3661_v0  ;;  %v1422_v27 = vadd.f32 %v2030_v55, %v1421_v58  ;;  %v1430_v0 = vor.u32 1.1754944e-38, %v1429_v20 }
 0x265   :  { %1485 = vadd.xlane.f32.xlu0 %v1484_v26  ;;  %v1311_v53 = vsel %vm3790_vm14, %v1310_v56, %v1306_v62  ;;  %v1411_v46 = vsel %vm1410_vm6, %v2028_v48, %v1407_v38  ;;  %vm1413_vm8 = vcmp.eq.f32.partialorder %v1412_v31, 8.507059e+37  ;;  %vm1428_vm10 = vcmp.eq.f32.partialorder %v1427_v61, 8.507059e+37 }
 0x266   :  { %v3826_v54 = vmul.f32 %v1311_v53, %v3688_v50  ;;  %v1426_v4 = vsel %vm1425_vm7, %v2030_v55, %v1422_v27  ;;  %v1416_v22 = vsel %vm1413_vm8, %v1415_v39, %v1411_v46  ;;  %v2102_v2 = vmov 14  }
 0x267   :  { %v1431_v57 = vsel %vm1428_vm10, %v1430_v0, %v1426_v4  ;;  %v3832_v50 = vmul.f32 %v1416_v22, %v3598_v21  ;;  %v2103_v21 = vmov 10   ;;  %v4013_v52 = vmov 0  }
 0x268   :  { %v1475_v30 = vadd.f32 %v3826_v54, %v3820_v14  ;;  %v3835_v6 = vmul.f32 %v1431_v57, %v3693_v42  ;;  %v3848_v42 = vld [vmem:[%s3893_s3] sm:$0xff]  ;;  %v2104_v8 = vmov 12   ;;  %v4014_v1 = vmov 1  }
 0x269   :  { %vm1493_vm11 = vcmask 7168   ;;  %vm1515_vm12 = vcmask 15360  }
 0x26a   :  { %1476 = vadd.xlane.f32.xlu1 %v1475_v30  ;;  %v1481_v51 = vadd.f32 %v3835_v6, %v3832_v50 }
 0x272   :  { %1482 = vadd.xlane.f32.xlu1 %v1481_v51 }
 0x274   :  { %1505 = vperm.xlu2 %1921, %v2050_v11  }
 0x279   :  { %1509 = vperm.xlu0 %1922, %v2051_v37  }
 0x27c   :  { %1924 = vset.pattern.permute.xlu2 %v2102_v2 }
 0x27d   :  { %1562 = vperm.xlu2 %1924, %v2051_v37  }
 0x281   :  { %1927 = vset.pattern.permute.xlu0 %v2103_v21 }
 0x282   :  { %1569 = vperm.xlu0 %1927, %v3848_v42  }
 0x285   :  { %1926 = vset.pattern.permute.xlu2 %v2103_v21 }
 0x286   :  { %1577 = vperm.xlu2 %1926, %v2051_v37  }
 0x28a   :  { %1931 = vset.pattern.permute.xlu0 %v4013_v52 }
 0x28b   :  { %1501 = vperm.xlu1 %1920, %v3848_v42  }
 0x28e   :  { %1573 = vperm.xlu2 %1926, %v2050_v11  }
 0x293   :  { %1923 = vset.pattern.permute.xlu1 %v2104_v8 }
 0x294   :  { %1528 = vperm.xlu1 %1923, %v3848_v42  }
 0x296   :  { %1929 = vset.pattern.permute.xlu2 %v4014_v1 }
 0x29c   :  { %1925 = vset.pattern.permute.xlu1 %v2102_v2 }
 0x29d   :  { %1558 = vperm.xlu1 %1925, %v2050_v11  }
 0x2a5   :  { %1554 = vperm.xlu1 %1925, %v3848_v42  }
 0x2ad   :  { %1928 = vset.pattern.permute.xlu1 %v4014_v1 }
 0x2bc   :  { %v1480_v43 = vpop.xlane.xlu2 %1479 }
 0x2c7   :  { %v1489_v41 = vpop.xlane.xlu2 %1488 }
 0x2c8   :  { %v1495_v24 = vsel %vm1493_vm11, %v1480_v43, %v1489_v41 }
 0x2c9   :  { %v1498_v48 = vmul.f32 0.00390625, %v1495_v24 }
 0x2cf   :  { %v1492_v49 = vpop.xlane.xlu2 %1491 }
 0x2d7   :  { %v1506_v23 = vpop.permute.xlu2 %1505 }
 0x2d8   :  { %v1486_v12 = vpop.xlane.xlu0 %1485  ;;  %v1513_v31 = vmul.f32 %v1506_v23, %v1498_v48 }
 0x2da   :  { %v1517_v19 = vsel %vm1515_vm12, %v1513_v31, 0.0 }
 0x2dd   :  { %v1477_v36 = vpop.xlane.xlu1 %1476 }
 0x2de   :  { %v1494_v5 = vsel %vm1493_vm11, %v1477_v36, %v1486_v12 }
 0x2df   :  { %v1497_v10 = vmul.f32 0.00390625, %v1494_v5  ;;  %v1563_v38 = vpop.permute.xlu2 %1562 }
 0x2e5   :  { %v1483_v7 = vpop.xlane.xlu1 %1482 }
 0x2e6   :  { %v1496_v56 = vsel %vm1493_vm11, %v1483_v7, %v1492_v49 }
 0x2e7   :  { %v1499_v55 = vmul.f32 0.00390625, %v1496_v56  ;;  %v1578_v4 = vpop.permute.xlu2 %1577 }
 0x2eb   :  { %v1510_v34 = vpop.permute.xlu0 %1509 }
 0x2ec   :  { %v1514_v32 = vmul.f32 %v1510_v34, %v1499_v55 }
 0x2ee   :  { %v1519_v16 = vsel %vm1515_vm12, %v1514_v32, 0.0 }
 0x2ef   :  { %v1574_v41 = vpop.permute.xlu2 %1573 }
 0x2f4   :  { %v1570_v43 = vpop.permute.xlu0 %1569 }
 0x2fd   :  { %v1502_v60 = vpop.permute.xlu1 %1501 }
 0x2fe   :  { %v1512_v33 = vmul.f32 %v1502_v60, %v1497_v10 }
 0x300   :  { %v1516_v13 = vsel %vm1515_vm12, %v1512_v33, 0.0 }
 0x301   :  { %v1518_v40 = vadd.f32 %v1517_v19, %v1516_v13 }
 0x303   :  { %v1520_v59 = vadd.f32 %v1519_v16, %v1518_v40 }
 0x305   :  { %v1521_v61 = vrot.slane %v1520_v59, 4 }
 0x306   :  { %v1529_v26 = vpop.permute.xlu1 %1528 }
 0x307   :  { %v1522_v3 = vadd.f32 %v1521_v61, %v1520_v59 }
 0x309   :  { %v1523_v44 = vrot.slane %v1522_v3, 2 }
 0x30b   :  { %v1524_v45 = vadd.f32 %v1523_v44, %v1522_v3 }
 0x30d   :  { %v1525_v20 = vrot.slane %v1524_v45, 1 }
 0x30f   :  { %v1526_v63 = vadd.f32 %v1525_v20, %v1524_v45  ;;  %v1559_v39 = vpop.permute.xlu1 %1558 }
 0x311   :  { %v1531_v25 = vadd.f32 %v1529_v26, %v1526_v63 }
 0x313   :  { %v1863_v62 = vmul.f32 -1.442695, %v1531_v25 }
 0x315   :  { %2031 = vpow2.f32 %v1863_v62 }
 0x317   :  { %v1555_v8 = vpop.permute.xlu1 %1554 }
 0x31b   :  { %v2032_v58 = vpop.eup %2031 }
 0x31c   :  { %v1535_v53 = vadd.f32 1.0, %v2032_v58 }
 0x31e   :  { %2033 = vrcp.f32 %v1535_v53  ;;  %v1547_v30 = vand.u32 2147483648, %v1535_v53  ;;  %v1545_v57 = vand.u32 2147483647, %v1535_v53  ;;  %vm1541_vm0 = vweird.f32 %v1535_v53 }
 0x320   :  { %v1548_v11 = vor.u32 1.1754944e-38, %v1547_v30  ;;  %vm1546_vm2 = vcmp.eq.f32.partialorder %v1545_v57, 8.507059e+37 }
 0x324   :  { %v2034_v27 = vpop.eup %2033 }
 0x325   :  { %v1537_v46 = vmul.f32 %v2034_v27, %v1535_v53  ;;  %vm1542_vm14 = vweird.f32 %v2034_v27 }
 0x326   :  { %vm1543_vm9 = vmor %vm1541_vm0, %vm1542_vm14  ;;  %vm1708_vm14 = vcmask 195584   ;;  %vm1802_vm0 = vcmask 1043456  }
 0x327   :  { %v1538_v0 = vsub.f32 1.0, %v1537_v46 }
 0x329   :  { %v1539_v22 = vmul.f32 %v2034_v27, %v1538_v0 }
 0x32b   :  { %v1540_v51 = vadd.f32 %v2034_v27, %v1539_v22 }
 0x32d   :  { %v1544_v37 = vsel %vm1543_vm9, %v2034_v27, %v1540_v51 }
 0x32e   :  { %v1549_v2 = vsel %vm1546_vm2, %v1548_v11, %v1544_v37 }
 0x32f   :  { %v1551_v21 = vmul.f32 %v1549_v2, %v1531_v25 }
 0x331   :  { %v1552_v1 = vperm.slane %v1551_v21, 0 }
 0x333   :  { %v1567_v36 = vmul.f32 %v1563_v38, %v1552_v1  ;;  %v1566_v49 = vmul.f32 %v1559_v39, %v1552_v1  ;;  %v1565_v12 = vmul.f32 %v1555_v8, %v1552_v1 }
 0x335   :  { %v1582_v7 = vadd.f32 %v1578_v4, %v1567_v36  ;;  %v1580_v24 = vadd.f32 %v1570_v43, %v1565_v12  ;;  %v1581_v5 = vadd.f32 %v1574_v41, %v1566_v49  ;;  %v2105_v41 = vmov 11  }
 0x337   :  { %v1866_v23 = vmul.f32 -1.442695, %v1582_v7  ;;  %v1864_v56 = vmul.f32 -1.442695, %v1580_v24  ;;  %v1865_v48 = vmul.f32 -1.442695, %v1581_v5 }
 0x339   :  { %2035 = vpow2.f32 %v1866_v23 }
 0x33a   :  { %2037 = vpow2.f32 %v1864_v56 }
 0x33b   :  { %2039 = vpow2.f32 %v1865_v48  ;;  %v2053_v48 = vld [vmem:[%s3890_s0 + $0x10] sm:$0x1f] }
 0x33f   :  { %v2036_v34 = vpop.eup %2035 }
 0x340   :  { %v2038_v10 = vpop.eup %2037  ;;  %v1594_v31 = vadd.f32 1.0, %v2036_v34 }
 0x341   :  { %v2040_v55 = vpop.eup %2039  ;;  %v1592_v60 = vadd.f32 1.0, %v2038_v10 }
 0x342   :  { %2041 = vrcp.f32 %v1594_v31  ;;  %v1593_v32 = vadd.f32 1.0, %v2040_v55  ;;  %v1636_v3 = vand.u32 2147483648, %v1594_v31  ;;  %v1634_v20 = vand.u32 2147483647, %v1594_v31 }
 0x343   :  { %2043 = vrcp.f32 %v1592_v60  ;;  %vm1630_vm3 = vweird.f32 %v1594_v31  ;;  %v1606_v57 = vand.u32 2147483648, %v1592_v60  ;;  %vm1600_vm10 = vweird.f32 %v1592_v60 }
 0x344   :  { %2045 = vrcp.f32 %v1593_v32  ;;  %v1619_v63 = vand.u32 2147483647, %v1593_v32  ;;  %v1621_v25 = vand.u32 2147483648, %v1593_v32  ;;  %v1637_v38 = vor.u32 1.1754944e-38, %v1636_v3 }
 0x345   :  { %vm1635_vm13 = vcmp.eq.f32.partialorder %v1634_v20, 8.507059e+37  ;;  %vm1615_vm6 = vweird.f32 %v1593_v32  ;;  %v1604_v51 = vand.u32 2147483647, %v1592_v60  ;;  %v1607_v37 = vor.u32 1.1754944e-38, %v1606_v57 }
 0x346   :  { %v1622_v0 = vor.u32 1.1754944e-38, %v1621_v25  ;;  %vm1620_vm7 = vcmp.eq.f32.partialorder %v1619_v63, 8.507059e+37 }
 0x347   :  { %vm1605_vm12 = vcmp.eq.f32.partialorder %v1604_v51, 8.507059e+37 }
 0x348   :  { %v2042_v33 = vpop.eup %2041 }
 0x349   :  { %v2044_v19 = vpop.eup %2043  ;;  %v1626_v13 = vmul.f32 %v2042_v33, %v1594_v31  ;;  %vm1631_vm4 = vweird.f32 %v2042_v33 }
 0x34a   :  { %v2046_v40 = vpop.eup %2045  ;;  %v1596_v16 = vmul.f32 %v2044_v19, %v1592_v60  ;;  %vm1632_vm1 = vmor %vm1630_vm3, %vm1631_vm4  ;;  %vm1601_vm8 = vweird.f32 %v2044_v19 }
 0x34b   :  { %v1627_v59 = vsub.f32 1.0, %v1626_v13  ;;  %v1611_v61 = vmul.f32 %v2046_v40, %v1593_v32  ;;  %vm1616_vm15 = vweird.f32 %v2046_v40  ;;  %vm1602_vm11 = vmor %vm1600_vm10, %vm1601_vm8 }
 0x34c   :  { %v1597_v44 = vsub.f32 1.0, %v1596_v16  ;;  %vm1617_vm5 = vmor %vm1615_vm6, %vm1616_vm15 }
 0x34d   :  { %v1628_v45 = vmul.f32 %v2042_v33, %v1627_v59  ;;  %v1612_v26 = vsub.f32 1.0, %v1611_v61 }
 0x34e   :  { %v1598_v53 = vmul.f32 %v2044_v19, %v1597_v44 }
 0x34f   :  { %v1629_v62 = vadd.f32 %v2042_v33, %v1628_v45  ;;  %v1613_v58 = vmul.f32 %v2046_v40, %v1612_v26 }
 0x350   :  { %v1599_v4 = vadd.f32 %v2044_v19, %v1598_v53 }
 0x351   :  { %v1633_v27 = vsel %vm1632_vm1, %v2042_v33, %v1629_v62  ;;  %v1614_v46 = vadd.f32 %v2046_v40, %v1613_v58 }
 0x352   :  { %v1638_v39 = vsel %vm1635_vm13, %v1637_v38, %v1633_v27  ;;  %v1603_v11 = vsel %vm1602_vm11, %v2044_v19, %v1599_v4  ;;  %v2055_v19 = vld [vmem:[%s3890_s0] sm:$0x1f] }
 0x353   :  { %1664 = vperm.xlu1 %1928, %v1638_v39   ;;  %v1618_v30 = vsel %vm1617_vm5, %v2046_v40, %v1614_v46  ;;  %v1608_v2 = vsel %vm1605_vm12, %v1607_v37, %v1603_v11  ;;  %v2056_v40 = vld [vmem:[%s3890_s0 + $0x8] sm:$0x1f] }
 0x354   :  { %v1623_v22 = vsel %vm1620_vm7, %v1622_v0, %v1618_v30 }
 0x355   :  { %1672 = vperm.xlu0 %1931, %v1623_v22   ;;  %1659 = vperm.xlu2 %1929, %v1623_v22  }
 0x35b   :  { %1654 = vperm.xlu1 %1928, %v1608_v2  }
 0x35d   :  { %1930 = vset.pattern.permute.xlu2 %v4013_v52  ;;  %1934 = vset.pattern.permute.xlu0 %v2105_v41 }
 0x35e   :  { %1676 = vperm.xlu2 %1930, %v1638_v39  }
 0x363   :  { %1932 = vset.pattern.permute.xlu1 %v4013_v52 }
 0x364   :  { %1668 = vperm.xlu1 %1932, %v1608_v2  }
 0x366   :  { %1933 = vset.pattern.permute.xlu2 %v2105_v41 }
 0x367   :  { %1705 = vperm.xlu2 %1933, %v3848_v42  }
 0x3af   :  { %v1660_v21 = vpop.permute.xlu2 %1659 }
 0x3b8   :  { %v1677_v8 = vpop.permute.xlu2 %1676 }
 0x3b9   :  { %v1699_v1 = vmul.f32 %v1677_v8, %v3832_v50  ;;  %v1700_v43 = vmul.f32 %v1677_v8, %v3835_v6  ;;  %v1697_v50 = vmul.f32 %v1660_v21, %v3730_v47  ;;  %v1698_v6 = vmul.f32 %v1660_v21, %v3733_v29 }
 0x3bb   :  { %1725 = vmatpush.msrb.mxu0 %v1699_v1  ;;  %1745 = vmatpush.msrb.mxu1 %v1700_v43 }
 0x3c5   :  { %v1665_v36 = vpop.permute.xlu1 %1664 }
 0x3c6   :  { %v1701_v49 = vmul.f32 %v1665_v36, %v3737_v35  ;;  %v1702_v12 = vmul.f32 %v1665_v36, %v3740_v15 }
 0x3c7   :  { %v1673_v52 = vpop.permute.xlu0 %1672 }
 0x3c8   :  { %v1695_v7 = vmul.f32 %v1673_v52, %v3635_v18  ;;  %v1696_v24 = vmul.f32 %v1673_v52, %v3648_v9  ;;  %1765 = vmatpush.msrb.mxu2 %v1701_v49  ;;  %1785 = vmatpush.msrb.mxu3 %v1702_v12  ;;  %v1703_v18 = vld [vmem:[%s3892_s2] sm:$0xf] }
 0x3ca   :  { %1726 = vmatpush.msrb.mxu0 %v1695_v7  ;;  %1746 = vmatpush.msrb.mxu1 %v1696_v24 }
 0x3cb   :  { %1766 = vmatpush.msrb.mxu2 %v1697_v50  ;;  %1786 = vmatpush.msrb.mxu3 %v1698_v6 }
 0x3cd   :  { %v1655_v42 = vpop.permute.xlu1 %1654 }
 0x3ce   :  { %v1693_v35 = vmul.f32 %v1655_v42, %v3798_v28  ;;  %v1694_v15 = vmul.f32 %v1655_v42, %v3805_v17  ;;  %v1706_v28 = vpop.permute.xlu2 %1705 }
 0x3d0   :  { %1767 = vmatpush.msrb.mxu2 %v1693_v35  ;;  %1787 = vmatpush.msrb.mxu3 %v1694_v15 }
 0x3d1   :  { %1869 = vmatmul.msk.f32.vlgmr.msrb.gmra.mxu2 %vm1708_vm14, %v1703_v18  ;;  %1870 = vmatmul.msk.f32.vlgmr.msrb.gmra.mxu3 %vm1708_vm14, %v1703_v18 }
 0x3d6   :  { %v1669_v9 = vpop.permute.xlu1 %1668 }
 0x3d7   :  { %v1691_v47 = vmul.f32 %v1669_v9, %v3820_v14  ;;  %v1692_v29 = vmul.f32 %v1669_v9, %v3826_v54  ;;  %v2054_v14 = vld [vmem:[%s3890_s0 + $0x18] sm:$0x1f] }
 0x3d9   :  { %1727 = vmatpush.msrb.mxu0 %v1691_v47  ;;  %1747 = vmatpush.msrb.mxu1 %v1692_v29 }
 0x3da   :  { %1867 = vmatmul.msk.f32.vlgmr.msrb.gmra.mxu0 %vm1708_vm14, %v1703_v18  ;;  %1868 = vmatmul.msk.f32.vlgmr.msrb.gmra.mxu1 %vm1708_vm14, %v1703_v18 }
 0x454   :  { %v1769_v17 = vpop.f32.mrf.mxu2  ;;  %v1789_v5 = vpop.f32.mrf.mxu3 }
 0x455   :  { %v1770_v23 = vadd.f32 %v1769_v17, %v1706_v28  ;;  %v1790_v56 = vadd.f32 %v1789_v5, %v1706_v28 }
 0x457   :  { %v1794_v34 = vadd.f32 %v2053_v48, %v1770_v23  ;;  %v1795_v10 = vadd.f32 %v2054_v14, %v1790_v56  ;;  %v1729_v54 = vpop.f32.mrf.mxu0  ;;  %v1749_v31 = vpop.f32.mrf.mxu1 }
 0x458   :  { %v1730_v55 = vadd.f32 %v1729_v54, %v1706_v28  ;;  %v1750_v60 = vadd.f32 %v1749_v31, %v1706_v28 }
 0x459   :  { %v1798_v32 = vrot.slane %v1794_v34, 4  ;;  %v1799_v33 = vrot.slane %v1795_v10, 4 }
 0x45a   :  { %v1792_v13 = vadd.f32 %v2055_v19, %v1730_v55  ;;  %v1793_v16 = vadd.f32 %v2056_v40, %v1750_v60 }
 0x45c   :  { %v1803_v59 = vsel %vm1802_vm0, %v1792_v13, %v1798_v32  ;;  %v1804_v61 = vsel %vm1802_vm0, %v1793_v16, %v1799_v33 }
 0x45d   :  { %1805 = vst [vmem:[#allocation2] sm:$0xff] %v1803_v59 }
 0x45e   :  { %1806 = vst [vmem:[#allocation2 + $0x8] sm:$0xff] %v1804_v61 }
 0x45f   :  { %1817 = dma.vmem_to_hbm [thread:$0]  %s1813_s7, 256, %s1815_s9, [#allocation3]  }
 0x460   :  { %2081 = dma.done.wait [#allocation3], 256  }
 0x461   :  { %2082 = vsyncadd [#allocation3], 4294967040 }
 0x462   :  { %1822 = vsyncpa [#allocation3], 1 }

</bundles_post_ra>
